<compile_context>
chip_gen: v6e
topology: v6e:2x2x1
jax: 0.10.0
libtpu: 0.0.40
codegen_flags: <defaults>
</compile_context>

<pallas_src>
import math

import numpy as np

import jax
import jax.numpy as jnp
from jax.experimental import pallas as pl
from jax.experimental.pallas import tpu as pltpu

# ---------------- configuration (small, consistent with the module) ----------
IMAGE_SIZE = 16
PATCH_SIZE = 4
NUM_CLASSES = 10
DIM = 32
DEPTH = 2
HEADS = 4
MLP_DIM = 64
CHANNELS = 1
BATCH = 2          # the attention axis length (batch_first=False quirk)

NUM_PATCHES = (IMAGE_SIZE // PATCH_SIZE) ** 2          # 16
PATCH_DIM = CHANNELS * PATCH_SIZE ** 2                 # 16
SEQ = NUM_PATCHES + 1                                  # 17 (cls + patches)
SEQ_PAD = 24                                           # 17 rounded up to 8-mult
STACK = 2 * SEQ_PAD                                    # 48: both images stacked
HEAD_DIM = DIM // HEADS                                # 8
EPS = 1e-5                                             # PyTorch LayerNorm default
LANES = 128

assert BATCH == 2, "fused kernel specializes the 2-way attention softmax to B=2"

# ---------------- parameter-slab layout ---------------------------------------
# Vector slab: one row per 1-D parameter, zero-padded to 128 lanes.
R_PE_G1, R_PE_B1, R_PE_B, R_PE_G2, R_PE_B2 = 0, 1, 2, 3, 4
R_HEAD_G, R_HEAD_B, R_HEAD_BIAS = 5, 6, 7
R_LAYER_BASE = 8
R_LAYER_STRIDE = 8
RL_BQKV, RL_BO, RL_G1, RL_BE1, RL_BF1, RL_BF2, RL_G2, RL_BE2 = range(8)
VEC_ROWS = R_LAYER_BASE + R_LAYER_STRIDE * DEPTH       # 24
VEC_ROWS_PAD = ((VEC_ROWS + 7) // 8) * 8               # 24

# Matrix slab: each weight / constant matrix zero-padded into a (64, 128) slot.
M_PE_W, M_HEAD_W = 0, 1
M_SEL, M_SWAP, M_HEADMIX, M_MEAN16, M_MEAN32, M_POS, M_CLS = 2, 3, 4, 5, 6, 7, 8
M_LAYER_BASE = 9
M_LAYER_STRIDE = 4
ML_WQKV, ML_WO, ML_W1, ML_W2 = range(4)
NMAT = M_LAYER_BASE + M_LAYER_STRIDE * DEPTH           # 17
MAT_ROWS = 64                                          # max input dim (MLP_DIM)


# ---------------- the single fused kernel (one grid step = one image pair) ----
def fused_vit_kernel(patches_ref, vecs_ref, mats_ref, o_ref):
    vecs = vecs_ref[...]                                   # (24, 128) in VMEM

    def vrow(r, n=DIM):                                    # (1, n) parameter row
        return vecs[r:r + 1, :n]

    def mat(i, rows, cols):                                # (rows, cols) weight
        return mats_ref[i][:rows, :cols]

    # Precomputed constant matrices (packed once in pack_params).
    mean16 = mat(M_MEAN16, PATCH_DIM, PATCH_DIM)           # all 1/16
    mean32 = mat(M_MEAN32, DIM, DIM)                       # all 1/32
    head_mix = mat(M_HEADMIX, DIM, DIM)                    # block-diag per head
    swap = mat(M_SWAP, STACK, STACK)                       # swap top/bottom halves
    sel = mat(M_SEL, STACK, 2 * NUM_PATCHES)               # token assembly selector
    pos = mat(M_POS, STACK, DIM)                           # stacked pos (+cls in row 0/24)
    cls_sel = mat(M_CLS, 8, STACK)                         # pick the two cls rows

    def _ln(x, g, b, mean_w):
        # Row statistics via matmuls against a constant 1/n matrix: the two
        # reductions run on the (otherwise idle) MXU instead of the XLU, and
        # there are no divides on the critical path.
        mu = jnp.dot(x, mean_w, preferred_element_type=jnp.float32)
        xc = x - mu
        var = jnp.dot(xc * xc, mean_w, preferred_element_type=jnp.float32)
        return xc * jax.lax.rsqrt(var + EPS) * g + b

    # ---- patch embedding: LN -> Linear -> LN for both images at once ---------
    patches = patches_ref[...][:, :PATCH_DIM]              # (32, 16)
    h = _ln(patches, vrow(R_PE_G1, PATCH_DIM), vrow(R_PE_B1, PATCH_DIM), mean16)
    emb = jnp.dot(h, mat(M_PE_W, PATCH_DIM, DIM),
                  preferred_element_type=jnp.float32) + vrow(R_PE_B)
    emb = _ln(emb, vrow(R_PE_G2), vrow(R_PE_B2), mean32)   # (32, 32)

    # ---- token assembly: stacked [cls ; patches ; pad] + pos for both images -
    # Rows 0:17 = image-0 tokens, 17:24 pad, 24:41 = image-1 tokens, 41:48 pad.
    x = pos + jnp.dot(sel, emb, preferred_element_type=jnp.float32)   # (48, 32)

    half_scale = 0.5 / math.sqrt(HEAD_DIM)

    # ---- transformer encoder layers (post-LN, relu) --------------------------
    # Attention mixes the two true-batch rows for every token position & head;
    # the cross-row interaction is one constant SWAP matmul on the stacked slab.
    for l in range(DEPTH):
        rb = R_LAYER_BASE + R_LAYER_STRIDE * l
        mb = M_LAYER_BASE + M_LAYER_STRIDE * l
        wqkv = mat(mb + ML_WQKV, DIM, 3 * DIM)
        bqkv = vrow(rb + RL_BQKV, 3 * DIM)
        wo = mat(mb + ML_WO, DIM, DIM)
        bo = vrow(rb + RL_BO)
        g1, be1 = vrow(rb + RL_G1), vrow(rb + RL_BE1)
        w1 = mat(mb + ML_W1, DIM, MLP_DIM)
        bf1 = vrow(rb + RL_BF1, MLP_DIM)
        w2 = mat(mb + ML_W2, MLP_DIM, DIM)
        bf2 = vrow(rb + RL_BF2)
        g2, be2 = vrow(rb + RL_G2), vrow(rb + RL_BE2)

        # fused QKV projection, single MXU pass for both images
        qkv = jnp.dot(x, wqkv, preferred_element_type=jnp.float32) + bqkv  # (48, 96)
        q = qkv[:, :DIM]
        kv = qkv[:, DIM:]                                  # (48, 64) = [k | v]
        kv_sw = jnp.dot(swap, kv, preferred_element_type=jnp.float32)     # other image's k|v
        k, v = kv[:, :DIM], kv[:, DIM:]
        k_sw, v_sw = kv_sw[:, :DIM], kv_sw[:, DIM:]

        # per-head score difference (replicated across each head's lanes);
        # softmax over the 2 attention rows == sigmoid == 0.5*tanh(x/2)+0.5
        d = jnp.dot(q * (k - k_sw), head_mix, preferred_element_type=jnp.float32)
        p = 0.5 * jnp.tanh(d * half_scale) + 0.5
        a = v_sw + p * (v - v_sw)                          # (48, 32) attn output

        attn = jnp.dot(a, wo, preferred_element_type=jnp.float32) + bo
        x = _ln(x + attn, g1, be1, mean32)

        # feed-forward (relu); dropouts are identity in eval mode
        hmid = jnp.maximum(
            jnp.dot(x, w1, preferred_element_type=jnp.float32) + bf1, 0.0)
        f = jnp.dot(hmid, w2, preferred_element_type=jnp.float32) + bf2
        x = _ln(x + f, g2, be2, mean32)

    # ---- MLP head on the two cls rows; single unmasked (8, 128) store --------
    cls = jnp.dot(cls_sel, x, preferred_element_type=jnp.float32)      # (8, 32)
    cls = _ln(cls, vrow(R_HEAD_G), vrow(R_HEAD_B), mean32)
    head_w = mats_ref[M_HEAD_W][:DIM, :]                   # (32, 128) zero-padded
    head_bias = vecs[R_HEAD_BIAS:R_HEAD_BIAS + 1, :]       # (1, 128) zero-padded
    o_ref[...] = (jnp.dot(cls, head_w, preferred_element_type=jnp.float32)
                  + head_bias)


# ---------------- wrapper ------------------------------------------------------
def _extract_patches(img):
    # rearrange 'b c (h p1) (w p2) -> (b h w) (p1 p2 c)'  (single XLA op)
    # TODO(synk): the einops-style patch rearrange stays as one plain-JAX
    # reshape/transpose; doing the blocked transpose in-kernel would need
    # unsupported sub-lane relayouts for no measurable gain at this size.
    B, C, H, W = img.shape
    p = PATCH_SIZE
    hh, ww = H // p, W // p
    x = img.reshape(B, C, hh, p, ww, p)
    x = jnp.transpose(x, (0, 2, 4, 3, 5, 1))
    return x.reshape(B * hh * ww, p * p * C)


def vit_forward(imgs, vecs, mats):
    """imgs: (NPAIRS*2, C, H, W); each consecutive pair of images is one
    independent module forward (batch=2, matching the PyTorch spec)."""
    npairs = imgs.shape[0] // BATCH
    patches = _extract_patches(imgs)                        # (NPAIRS*32, 16)
    # lane-dense input DMA: one contiguous (32, 128) block per pair
    patches = jnp.pad(patches, ((0, 0), (0, LANES - PATCH_DIM)))

    out_padded = pl.pallas_call(
        fused_vit_kernel,
        out_shape=jax.ShapeDtypeStruct((npairs * 8, LANES), jnp.float32),
        grid_spec=pltpu.PrefetchScalarGridSpec(
            num_scalar_prefetch=0,
            grid=(npairs,),
            in_specs=[
                # per-pair patch block, pipelined across the grid
                pl.BlockSpec((BATCH * NUM_PATCHES, LANES), lambda p: (p, 0)),
                # parameter slabs: constant index_map -> DMA'd once, VMEM-resident
                pl.BlockSpec((VEC_ROWS_PAD, LANES), lambda p: (0, 0)),
                pl.BlockSpec((NMAT, MAT_ROWS, LANES), lambda p: (0, 0, 0)),
            ],
            out_specs=pl.BlockSpec((8, LANES), lambda p: (p, 0)),
        ),
        compiler_params=pltpu.CompilerParams(
            dimension_semantics=("parallel",)),             # pairs split across TCs (v7x)
    )(patches, vecs, mats)

    out = out_padded.reshape(npairs, 8, LANES)[:, :BATCH, :NUM_CLASSES]
    return out.reshape(npairs * BATCH, NUM_CLASSES)


# ---------------- parameter packing (once, outside the jitted forward) --------
def pack_params(params):
    vecs = jnp.zeros((VEC_ROWS_PAD, LANES), jnp.float32)

    def setv(v, row, arr):
        arr = jnp.asarray(arr, jnp.float32).reshape(-1)
        return v.at[row, :arr.shape[0]].set(arr)

    vecs = setv(vecs, R_PE_G1, params['pe_g1'])
    vecs = setv(vecs, R_PE_B1, params['pe_b1'])
    vecs = setv(vecs, R_PE_B, params['pe_b'])
    vecs = setv(vecs, R_PE_G2, params['pe_g2'])
    vecs = setv(vecs, R_PE_B2, params['pe_b2'])
    vecs = setv(vecs, R_HEAD_G, params['head_g'])
    vecs = setv(vecs, R_HEAD_B, params['head_b'])
    vecs = setv(vecs, R_HEAD_BIAS, params['head_bias'])
    for l, lp in enumerate(params['layers']):
        rb = R_LAYER_BASE + R_LAYER_STRIDE * l
        vecs = setv(vecs, rb + RL_BQKV,
                    jnp.concatenate([lp['bq'], lp['bk'], lp['bv']], axis=1))
        vecs = setv(vecs, rb + RL_BO, lp['bo'])
        vecs = setv(vecs, rb + RL_G1, lp['g1'])
        vecs = setv(vecs, rb + RL_BE1, lp['be1'])
        vecs = setv(vecs, rb + RL_BF1, lp['bf1'])
        vecs = setv(vecs, rb + RL_BF2, lp['bf2'])
        vecs = setv(vecs, rb + RL_G2, lp['g2'])
        vecs = setv(vecs, rb + RL_BE2, lp['be2'])

    mats = jnp.zeros((NMAT, MAT_ROWS, LANES), jnp.float32)

    def setm(m, idx, arr):
        arr = jnp.asarray(arr, jnp.float32)
        return m.at[idx, :arr.shape[0], :arr.shape[1]].set(arr)

    mats = setm(mats, M_PE_W, params['pe_w'])
    mats = setm(mats, M_HEAD_W, params['head_w'])
    for l, lp in enumerate(params['layers']):
        mb = M_LAYER_BASE + M_LAYER_STRIDE * l
        mats = setm(mats, mb + ML_WQKV,
                    jnp.concatenate([lp['wq'], lp['wk'], lp['wv']], axis=1))
        mats = setm(mats, mb + ML_WO, lp['wo'])
        mats = setm(mats, mb + ML_W1, lp['w1'])
        mats = setm(mats, mb + ML_W2, lp['w2'])

    # ---- compile-time constant matrices (no in-kernel iota/compare work) -----
    # LayerNorm 1/n mean matrices
    mats = setm(mats, M_MEAN16, np.full((PATCH_DIM, PATCH_DIM), 1.0 / PATCH_DIM,
                                        np.float32))
    mats = setm(mats, M_MEAN32, np.full((DIM, DIM), 1.0 / DIM, np.float32))
    # block-diagonal ones: 1 iff two lanes belong to the same head
    hm = (np.arange(DIM)[:, None] // HEAD_DIM ==
          np.arange(DIM)[None, :] // HEAD_DIM).astype(np.float32)
    mats = setm(mats, M_HEADMIX, hm)
    # token-assembly selector: slab row 1+i <- patch i (img 0),
    #                          slab row 24+1+i <- patch 16+i (img 1)
    sel = np.zeros((STACK, 2 * NUM_PATCHES), np.float32)
    sel[1:1 + NUM_PATCHES, :NUM_PATCHES] = np.eye(NUM_PATCHES, dtype=np.float32)
    sel[SEQ_PAD + 1:SEQ_PAD + 1 + NUM_PATCHES, NUM_PATCHES:] = \
        np.eye(NUM_PATCHES, dtype=np.float32)
    mats = setm(mats, M_SEL, sel)
    # swap matrix: exchanges the two 24-row halves of the stacked slab
    sw = np.zeros((STACK, STACK), np.float32)
    sw[:SEQ_PAD, SEQ_PAD:] = np.eye(SEQ_PAD, dtype=np.float32)
    sw[SEQ_PAD:, :SEQ_PAD] = np.eye(SEQ_PAD, dtype=np.float32)
    mats = setm(mats, M_SWAP, sw)
    # cls-row selector: rows 0/1 pick slab rows 0 and 24
    cs = np.zeros((8, STACK), np.float32)
    cs[0, 0] = 1.0
    cs[1, SEQ_PAD] = 1.0
    mats = setm(mats, M_CLS, cs)
    # stacked positional embedding with the cls token folded into rows 0 / 24
    pos_cls = params['pos_embedding'][0, :SEQ]
    pos_cls = pos_cls.at[0].add(params['cls_token'][0, 0])
    pos_stacked = jnp.zeros((STACK, DIM), jnp.float32)
    pos_stacked = pos_stacked.at[:SEQ].set(pos_cls)
    pos_stacked = pos_stacked.at[SEQ_PAD:SEQ_PAD + SEQ].set(pos_cls)
    mats = setm(mats, M_POS, pos_stacked)
    return vecs, mats


# ---------------- deterministic synthetic parameters --------------------------
# Linear weights stored pre-transposed as (in, out) so kernels compute y = x @ W.
def init_params(key):
    keys = list(jax.random.split(key, 8 + DEPTH * 12))
    it = iter(keys)

    def nrm(shape, scale=0.02):
        return scale * jax.random.normal(next(it), shape, dtype=jnp.float32)

    params = {
        'pe_g1': jnp.ones((1, PATCH_DIM), jnp.float32),
        'pe_b1': jnp.zeros((1, PATCH_DIM), jnp.float32),
        'pe_w': nrm((PATCH_DIM, DIM)),
        'pe_b': nrm((1, DIM)),
        'pe_g2': jnp.ones((1, DIM), jnp.float32),
        'pe_b2': jnp.zeros((1, DIM), jnp.float32),
        'pos_embedding': jax.random.normal(next(it), (1, NUM_PATCHES + 1, DIM), jnp.float32),
        'cls_token': jax.random.normal(next(it), (1, 1, DIM), jnp.float32),
        'head_g': jnp.ones((1, DIM), jnp.float32),
        'head_b': jnp.zeros((1, DIM), jnp.float32),
        'head_w': nrm((DIM, NUM_CLASSES)),
        'head_bias': nrm((1, NUM_CLASSES)),
        'layers': [],
    }
    for _ in range(DEPTH):
        params['layers'].append({
            'wq': nrm((DIM, DIM)), 'wk': nrm((DIM, DIM)), 'wv': nrm((DIM, DIM)),
            'bq': nrm((1, DIM)), 'bk': nrm((1, DIM)), 'bv': nrm((1, DIM)),
            'wo': nrm((DIM, DIM)), 'bo': nrm((1, DIM)),
            'g1': jnp.ones((1, DIM), jnp.float32), 'be1': jnp.zeros((1, DIM), jnp.float32),
            'w1': nrm((DIM, MLP_DIM)), 'bf1': nrm((1, MLP_DIM)),
            'w2': nrm((MLP_DIM, DIM)), 'bf2': nrm((1, DIM)),
            'g2': jnp.ones((1, DIM), jnp.float32), 'be2': jnp.zeros((1, DIM), jnp.float32),
        })
    return params


# ---------------- pure-JAX reference (same math) for a numeric check ----------
def _ln_ref(x, g, b):
    mu = jnp.mean(x, axis=-1, keepdims=True)
    xc = x - mu
    var = jnp.mean(xc * xc, axis=-1, keepdims=True)
    return xc / jnp.sqrt(var + EPS) * g + b


def vit_reference(img, params):
    B, C, H, W = img.shape
    p = PATCH_SIZE
    hh, ww = H // p, W // p
    patches = img.reshape(B, C, hh, p, ww, p).transpose(0, 2, 4, 3, 5, 1)
    patches = patches.reshape(B, hh * ww, p * p * C)

    x = _ln_ref(patches, params['pe_g1'][0], params['pe_b1'][0])
    x = x @ params['pe_w'] + params['pe_b'][0]
    tok = _ln_ref(x, params['pe_g2'][0], params['pe_b2'][0])

    cls = jnp.broadcast_to(params['cls_token'], (B, 1, DIM))
    tok = jnp.concatenate([cls, tok], axis=1) + params['pos_embedding'][:, :SEQ]

    x = jnp.transpose(tok, (1, 0, 2))                       # (SEQ, B, D): attn over B
    for lp in params['layers']:
        q = x @ lp['wq'] + lp['bq'][0]
        k = x @ lp['wk'] + lp['bk'][0]
        v = x @ lp['wv'] + lp['bv'][0]
        qh = q.reshape(SEQ, B, HEADS, HEAD_DIM)
        kh = k.reshape(SEQ, B, HEADS, HEAD_DIM)
        vh = v.reshape(SEQ, B, HEADS, HEAD_DIM)
        s = jnp.einsum('nlhd,nmhd->nhlm', qh, kh) / math.sqrt(HEAD_DIM)
        a = jax.nn.softmax(s, axis=-1)
        o = jnp.einsum('nhlm,nmhd->nlhd', a, vh).reshape(SEQ, B, DIM)
        attn_out = o @ lp['wo'] + lp['bo'][0]
        x = _ln_ref(x + attn_out, lp['g1'][0], lp['be1'][0])
        ff = jnp.maximum(x @ lp['w1'] + lp['bf1'][0], 0.0) @ lp['w2'] + lp['bf2'][0]
        x = _ln_ref(x + ff, lp['g2'][0], lp['be2'][0])
    encoded = jnp.transpose(x, (1, 0, 2))
    cls_enc = encoded[:, 0]
    h = _ln_ref(cls_enc, params['head_g'][0], params['head_b'][0])
    return h @ params['head_w'] + params['head_bias'][0]


# ---------------- main ---------------------------------------------------------
if __name__ == "__main__":
    key = jax.random.PRNGKey(0)
    pkey, xkey = jax.random.split(key)
    params = init_params(pkey)

    NPAIRS = 4   # micro-batch of independent (batch=2) module forwards
    img = jax.random.normal(
        xkey, (NPAIRS * BATCH, CHANNELS, IMAGE_SIZE, IMAGE_SIZE), dtype=jnp.float32)

    vecs, mats = pack_params(params)                        # packed once, reused
    fwd = jax.jit(vit_forward)
    out = jax.block_until_ready(fwd(img, vecs, mats))
    assert out.shape == (NPAIRS * BATCH, NUM_CLASSES), out.shape

    ref = jnp.concatenate(
        [vit_reference(img[p * BATCH:(p + 1) * BATCH], params) for p in range(NPAIRS)],
        axis=0)
    err = float(jnp.max(jnp.abs(out - ref)))
    assert err < 1e-3, f"max abs error vs reference: {err}"

    print("KERNEL_OK")
</pallas_src>

<mosaic_0001>
module attributes {stable_mosaic.version = 11 : i64} {
  func.func @fused_vit_kernel(%arg0: i32, %arg1: memref<32x128xf32, #tpu.memory_space<vmem>>, %arg2: memref<24x128xf32, #tpu.memory_space<vmem>>, %arg3: memref<17x64x128xf32, #tpu.memory_space<vmem>>, %arg4: memref<8x128xf32, #tpu.memory_space<vmem>>) attributes {dimension_semantics = [#tpu.dimension_semantics<parallel>], iteration_bounds = array<i64: 4>, scalar_prefetch = 0 : i64, scratch_operands = 0 : i64, tpu.core_type = #tpu.core_type<tc>, window_params = [{transform_indices = @transform_0, window_bounds = array<i64: 32, 128>}, {pipeline_mode = #tpu.pipeline_mode<synchronous>, transform_indices = @transform_1, window_bounds = array<i64: 24, 128>}, {pipeline_mode = #tpu.pipeline_mode<synchronous>, transform_indices = @transform_2, window_bounds = array<i64: 17, 64, 128>}, {transform_indices = @transform_3, window_bounds = array<i64: 8, 128>}]} {
    %c0 = arith.constant 0 : index
    %c0_0 = arith.constant 0 : index
    %0 = vector.load %arg2[%c0, %c0_0] : memref<24x128xf32, #tpu.memory_space<vmem>>, vector<24x128xf32>
    %c5 = arith.constant 5 : index
    %c0_1 = arith.constant 0 : index
    %c0_2 = arith.constant 0 : index
    %1 = vector.load %arg3[%c5, %c0_1, %c0_2] : memref<17x64x128xf32, #tpu.memory_space<vmem>>, vector<1x64x128xf32>
    %2 = vector.shape_cast %1 : vector<1x64x128xf32> to vector<64x128xf32>
    %3 = vector.extract_strided_slice %2 {offsets = [0, 0], sizes = [16, 16], strides = [1, 1]} : vector<64x128xf32> to vector<16x16xf32>
    %c6 = arith.constant 6 : index
    %c0_3 = arith.constant 0 : index
    %c0_4 = arith.constant 0 : index
    %4 = vector.load %arg3[%c6, %c0_3, %c0_4] : memref<17x64x128xf32, #tpu.memory_space<vmem>>, vector<1x64x128xf32>
    %5 = vector.shape_cast %4 : vector<1x64x128xf32> to vector<64x128xf32>
    %6 = vector.extract_strided_slice %5 {offsets = [0, 0], sizes = [32, 32], strides = [1, 1]} : vector<64x128xf32> to vector<32x32xf32>
    %c4 = arith.constant 4 : index
    %c0_5 = arith.constant 0 : index
    %c0_6 = arith.constant 0 : index
    %7 = vector.load %arg3[%c4, %c0_5, %c0_6] : memref<17x64x128xf32, #tpu.memory_space<vmem>>, vector<1x64x128xf32>
    %8 = vector.shape_cast %7 : vector<1x64x128xf32> to vector<64x128xf32>
    %9 = vector.extract_strided_slice %8 {offsets = [0, 0], sizes = [32, 32], strides = [1, 1]} : vector<64x128xf32> to vector<32x32xf32>
    %c3 = arith.constant 3 : index
    %c0_7 = arith.constant 0 : index
    %c0_8 = arith.constant 0 : index
    %10 = vector.load %arg3[%c3, %c0_7, %c0_8] : memref<17x64x128xf32, #tpu.memory_space<vmem>>, vector<1x64x128xf32>
    %11 = vector.shape_cast %10 : vector<1x64x128xf32> to vector<64x128xf32>
    %12 = vector.extract_strided_slice %11 {offsets = [0, 0], sizes = [48, 48], strides = [1, 1]} : vector<64x128xf32> to vector<48x48xf32>
    %c2 = arith.constant 2 : index
    %c0_9 = arith.constant 0 : index
    %c0_10 = arith.constant 0 : index
    %13 = vector.load %arg3[%c2, %c0_9, %c0_10] : memref<17x64x128xf32, #tpu.memory_space<vmem>>, vector<1x64x128xf32>
    %14 = vector.shape_cast %13 : vector<1x64x128xf32> to vector<64x128xf32>
    %15 = vector.extract_strided_slice %14 {offsets = [0, 0], sizes = [48, 32], strides = [1, 1]} : vector<64x128xf32> to vector<48x32xf32>
    %c7 = arith.constant 7 : index
    %c0_11 = arith.constant 0 : index
    %c0_12 = arith.constant 0 : index
    %16 = vector.load %arg3[%c7, %c0_11, %c0_12] : memref<17x64x128xf32, #tpu.memory_space<vmem>>, vector<1x64x128xf32>
    %17 = vector.shape_cast %16 : vector<1x64x128xf32> to vector<64x128xf32>
    %18 = vector.extract_strided_slice %17 {offsets = [0, 0], sizes = [48, 32], strides = [1, 1]} : vector<64x128xf32> to vector<48x32xf32>
    %c8 = arith.constant 8 : index
    %c0_13 = arith.constant 0 : index
    %c0_14 = arith.constant 0 : index
    %19 = vector.load %arg3[%c8, %c0_13, %c0_14] : memref<17x64x128xf32, #tpu.memory_space<vmem>>, vector<1x64x128xf32>
    %20 = vector.shape_cast %19 : vector<1x64x128xf32> to vector<64x128xf32>
    %21 = vector.extract_strided_slice %20 {offsets = [0, 0], sizes = [8, 48], strides = [1, 1]} : vector<64x128xf32> to vector<8x48xf32>
    %c0_15 = arith.constant 0 : index
    %c0_16 = arith.constant 0 : index
    %22 = vector.load %arg1[%c0_15, %c0_16] : memref<32x128xf32, #tpu.memory_space<vmem>>, vector<32x128xf32>
    %23 = vector.extract_strided_slice %22 {offsets = [0, 0], sizes = [32, 16], strides = [1, 1]} : vector<32x128xf32> to vector<32x16xf32>
    %24 = vector.extract_strided_slice %0 {offsets = [0, 0], sizes = [1, 16], strides = [1, 1]} : vector<24x128xf32> to vector<1x16xf32>
    %25 = vector.extract_strided_slice %0 {offsets = [1, 0], sizes = [1, 16], strides = [1, 1]} : vector<24x128xf32> to vector<1x16xf32>
    %cst = arith.constant dense<0.000000e+00> : vector<32x16xf32>
    %26 = tpu.matmul %23, %3, %cst {dimension_numbers = #tpu.dot_dimension_numbers<[1], [0], [0], [1], [0, 0, 1, 1], [], []>} : vector<32x16xf32>, vector<16x16xf32>, vector<32x16xf32> -> vector<32x16xf32>
    %27 = arith.subf %23, %26 : vector<32x16xf32>
    %28 = arith.mulf %27, %27 : vector<32x16xf32>
    %cst_17 = arith.constant dense<0.000000e+00> : vector<32x16xf32>
    %29 = tpu.matmul %28, %3, %cst_17 {dimension_numbers = #tpu.dot_dimension_numbers<[1], [0], [0], [1], [0, 0, 1, 1], [], []>} : vector<32x16xf32>, vector<16x16xf32>, vector<32x16xf32> -> vector<32x16xf32>
    %cst_18 = arith.constant 9.99999974E-6 : f32
    %30 = vector.broadcast %cst_18 : f32 to vector<32x16xf32>
    %31 = arith.addf %29, %30 : vector<32x16xf32>
    %32 = math.rsqrt %31 : vector<32x16xf32>
    %33 = arith.mulf %27, %32 : vector<32x16xf32>
    %34 = vector.broadcast %24 : vector<1x16xf32> to vector<32x16xf32>
    %35 = arith.mulf %33, %34 : vector<32x16xf32>
    %36 = vector.broadcast %25 : vector<1x16xf32> to vector<32x16xf32>
    %37 = arith.addf %35, %36 : vector<32x16xf32>
    %c0_19 = arith.constant 0 : index
    %c0_20 = arith.constant 0 : index
    %c0_21 = arith.constant 0 : index
    %38 = vector.load %arg3[%c0_19, %c0_20, %c0_21] : memref<17x64x128xf32, #tpu.memory_space<vmem>>, vector<1x64x128xf32>
    %39 = vector.shape_cast %38 : vector<1x64x128xf32> to vector<64x128xf32>
    %40 = vector.extract_strided_slice %39 {offsets = [0, 0], sizes = [16, 32], strides = [1, 1]} : vector<64x128xf32> to vector<16x32xf32>
    %cst_22 = arith.constant dense<0.000000e+00> : vector<32x32xf32>
    %41 = tpu.matmul %37, %40, %cst_22 {dimension_numbers = #tpu.dot_dimension_numbers<[1], [0], [0], [1], [0, 0, 1, 1], [], []>} : vector<32x16xf32>, vector<16x32xf32>, vector<32x32xf32> -> vector<32x32xf32>
    %42 = vector.extract_strided_slice %0 {offsets = [2, 0], sizes = [1, 32], strides = [1, 1]} : vector<24x128xf32> to vector<1x32xf32>
    %43 = vector.broadcast %42 : vector<1x32xf32> to vector<32x32xf32>
    %44 = arith.addf %41, %43 : vector<32x32xf32>
    %45 = vector.extract_strided_slice %0 {offsets = [3, 0], sizes = [1, 32], strides = [1, 1]} : vector<24x128xf32> to vector<1x32xf32>
    %46 = vector.extract_strided_slice %0 {offsets = [4, 0], sizes = [1, 32], strides = [1, 1]} : vector<24x128xf32> to vector<1x32xf32>
    %cst_23 = arith.constant dense<0.000000e+00> : vector<32x32xf32>
    %47 = tpu.matmul %44, %6, %cst_23 {dimension_numbers = #tpu.dot_dimension_numbers<[1], [0], [0], [1], [0, 0, 1, 1], [], []>} : vector<32x32xf32>, vector<32x32xf32>, vector<32x32xf32> -> vector<32x32xf32>
    %48 = arith.subf %44, %47 : vector<32x32xf32>
    %49 = arith.mulf %48, %48 : vector<32x32xf32>
    %cst_24 = arith.constant dense<0.000000e+00> : vector<32x32xf32>
    %50 = tpu.matmul %49, %6, %cst_24 {dimension_numbers = #tpu.dot_dimension_numbers<[1], [0], [0], [1], [0, 0, 1, 1], [], []>} : vector<32x32xf32>, vector<32x32xf32>, vector<32x32xf32> -> vector<32x32xf32>
    %cst_25 = arith.constant 9.99999974E-6 : f32
    %51 = vector.broadcast %cst_25 : f32 to vector<32x32xf32>
    %52 = arith.addf %50, %51 : vector<32x32xf32>
    %53 = math.rsqrt %52 : vector<32x32xf32>
    %54 = arith.mulf %48, %53 : vector<32x32xf32>
    %55 = vector.broadcast %45 : vector<1x32xf32> to vector<32x32xf32>
    %56 = arith.mulf %54, %55 : vector<32x32xf32>
    %57 = vector.broadcast %46 : vector<1x32xf32> to vector<32x32xf32>
    %58 = arith.addf %56, %57 : vector<32x32xf32>
    %cst_26 = arith.constant dense<0.000000e+00> : vector<48x32xf32>
    %59 = tpu.matmul %15, %58, %cst_26 {dimension_numbers = #tpu.dot_dimension_numbers<[1], [0], [0], [1], [0, 0, 1, 1], [], []>} : vector<48x32xf32>, vector<32x32xf32>, vector<48x32xf32> -> vector<48x32xf32>
    %60 = arith.addf %18, %59 : vector<48x32xf32>
    %c9 = arith.constant 9 : index
    %c0_27 = arith.constant 0 : index
    %c0_28 = arith.constant 0 : index
    %61 = vector.load %arg3[%c9, %c0_27, %c0_28] : memref<17x64x128xf32, #tpu.memory_space<vmem>>, vector<1x64x128xf32>
    %62 = vector.shape_cast %61 : vector<1x64x128xf32> to vector<64x128xf32>
    %63 = vector.extract_strided_slice %62 {offsets = [0, 0], sizes = [32, 96], strides = [1, 1]} : vector<64x128xf32> to vector<32x96xf32>
    %64 = vector.extract_strided_slice %0 {offsets = [8, 0], sizes = [1, 96], strides = [1, 1]} : vector<24x128xf32> to vector<1x96xf32>
    %c10 = arith.constant 10 : index
    %c0_29 = arith.constant 0 : index
    %c0_30 = arith.constant 0 : index
    %65 = vector.load %arg3[%c10, %c0_29, %c0_30] : memref<17x64x128xf32, #tpu.memory_space<vmem>>, vector<1x64x128xf32>
    %66 = vector.shape_cast %65 : vector<1x64x128xf32> to vector<64x128xf32>
    %67 = vector.extract_strided_slice %66 {offsets = [0, 0], sizes = [32, 32], strides = [1, 1]} : vector<64x128xf32> to vector<32x32xf32>
    %68 = vector.extract_strided_slice %0 {offsets = [9, 0], sizes = [1, 32], strides = [1, 1]} : vector<24x128xf32> to vector<1x32xf32>
    %69 = vector.extract_strided_slice %0 {offsets = [10, 0], sizes = [1, 32], strides = [1, 1]} : vector<24x128xf32> to vector<1x32xf32>
    %70 = vector.extract_strided_slice %0 {offsets = [11, 0], sizes = [1, 32], strides = [1, 1]} : vector<24x128xf32> to vector<1x32xf32>
    %c11 = arith.constant 11 : index
    %c0_31 = arith.constant 0 : index
    %c0_32 = arith.constant 0 : index
    %71 = vector.load %arg3[%c11, %c0_31, %c0_32] : memref<17x64x128xf32, #tpu.memory_space<vmem>>, vector<1x64x128xf32>
    %72 = vector.shape_cast %71 : vector<1x64x128xf32> to vector<64x128xf32>
    %73 = vector.extract_strided_slice %72 {offsets = [0, 0], sizes = [32, 64], strides = [1, 1]} : vector<64x128xf32> to vector<32x64xf32>
    %74 = vector.extract_strided_slice %0 {offsets = [12, 0], sizes = [1, 64], strides = [1, 1]} : vector<24x128xf32> to vector<1x64xf32>
    %c12 = arith.constant 12 : index
    %c0_33 = arith.constant 0 : index
    %c0_34 = arith.constant 0 : index
    %75 = vector.load %arg3[%c12, %c0_33, %c0_34] : memref<17x64x128xf32, #tpu.memory_space<vmem>>, vector<1x64x128xf32>
    %76 = vector.shape_cast %75 : vector<1x64x128xf32> to vector<64x128xf32>
    %77 = vector.extract_strided_slice %76 {offsets = [0, 0], sizes = [64, 32], strides = [1, 1]} : vector<64x128xf32> to vector<64x32xf32>
    %78 = vector.extract_strided_slice %0 {offsets = [13, 0], sizes = [1, 32], strides = [1, 1]} : vector<24x128xf32> to vector<1x32xf32>
    %79 = vector.extract_strided_slice %0 {offsets = [14, 0], sizes = [1, 32], strides = [1, 1]} : vector<24x128xf32> to vector<1x32xf32>
    %80 = vector.extract_strided_slice %0 {offsets = [15, 0], sizes = [1, 32], strides = [1, 1]} : vector<24x128xf32> to vector<1x32xf32>
    %cst_35 = arith.constant dense<0.000000e+00> : vector<48x96xf32>
    %81 = tpu.matmul %60, %63, %cst_35 {dimension_numbers = #tpu.dot_dimension_numbers<[1], [0], [0], [1], [0, 0, 1, 1], [], []>} : vector<48x32xf32>, vector<32x96xf32>, vector<48x96xf32> -> vector<48x96xf32>
    %82 = vector.broadcast %64 : vector<1x96xf32> to vector<48x96xf32>
    %83 = arith.addf %81, %82 : vector<48x96xf32>
    %84 = vector.extract_strided_slice %83 {offsets = [0, 0], sizes = [48, 32], strides = [1, 1]} : vector<48x96xf32> to vector<48x32xf32>
    %85 = vector.extract_strided_slice %83 {offsets = [0, 32], sizes = [48, 64], strides = [1, 1]} : vector<48x96xf32> to vector<48x64xf32>
    %cst_36 = arith.constant dense<0.000000e+00> : vector<48x64xf32>
    %86 = tpu.matmul %12, %85, %cst_36 {dimension_numbers = #tpu.dot_dimension_numbers<[1], [0], [0], [1], [0, 0, 1, 1], [], []>} : vector<48x48xf32>, vector<48x64xf32>, vector<48x64xf32> -> vector<48x64xf32>
    %87 = vector.extract_strided_slice %85 {offsets = [0, 0], sizes = [48, 32], strides = [1, 1]} : vector<48x64xf32> to vector<48x32xf32>
    %88 = vector.extract_strided_slice %85 {offsets = [0, 32], sizes = [48, 32], strides = [1, 1]} : vector<48x64xf32> to vector<48x32xf32>
    %89 = vector.extract_strided_slice %86 {offsets = [0, 0], sizes = [48, 32], strides = [1, 1]} : vector<48x64xf32> to vector<48x32xf32>
    %90 = vector.extract_strided_slice %86 {offsets = [0, 32], sizes = [48, 32], strides = [1, 1]} : vector<48x64xf32> to vector<48x32xf32>
    %91 = arith.subf %87, %89 : vector<48x32xf32>
    %92 = arith.mulf %84, %91 : vector<48x32xf32>
    %cst_37 = arith.constant dense<0.000000e+00> : vector<48x32xf32>
    %93 = tpu.matmul %92, %9, %cst_37 {dimension_numbers = #tpu.dot_dimension_numbers<[1], [0], [0], [1], [0, 0, 1, 1], [], []>} : vector<48x32xf32>, vector<32x32xf32>, vector<48x32xf32> -> vector<48x32xf32>
    %cst_38 = arith.constant 0.176776692 : f32
    %94 = vector.broadcast %cst_38 : f32 to vector<48x32xf32>
    %95 = arith.mulf %93, %94 : vector<48x32xf32>
    %96 = math.tanh %95 : vector<48x32xf32>
    %cst_39 = arith.constant 5.000000e-01 : f32
    %97 = vector.broadcast %cst_39 : f32 to vector<48x32xf32>
    %98 = arith.mulf %97, %96 : vector<48x32xf32>
    %cst_40 = arith.constant 5.000000e-01 : f32
    %99 = vector.broadcast %cst_40 : f32 to vector<48x32xf32>
    %100 = arith.addf %98, %99 : vector<48x32xf32>
    %101 = arith.subf %88, %90 : vector<48x32xf32>
    %102 = arith.mulf %100, %101 : vector<48x32xf32>
    %103 = arith.addf %90, %102 : vector<48x32xf32>
    %cst_41 = arith.constant dense<0.000000e+00> : vector<48x32xf32>
    %104 = tpu.matmul %103, %67, %cst_41 {dimension_numbers = #tpu.dot_dimension_numbers<[1], [0], [0], [1], [0, 0, 1, 1], [], []>} : vector<48x32xf32>, vector<32x32xf32>, vector<48x32xf32> -> vector<48x32xf32>
    %105 = vector.broadcast %68 : vector<1x32xf32> to vector<48x32xf32>
    %106 = arith.addf %104, %105 : vector<48x32xf32>
    %107 = arith.addf %60, %106 : vector<48x32xf32>
    %cst_42 = arith.constant dense<0.000000e+00> : vector<48x32xf32>
    %108 = tpu.matmul %107, %6, %cst_42 {dimension_numbers = #tpu.dot_dimension_numbers<[1], [0], [0], [1], [0, 0, 1, 1], [], []>} : vector<48x32xf32>, vector<32x32xf32>, vector<48x32xf32> -> vector<48x32xf32>
    %109 = arith.subf %107, %108 : vector<48x32xf32>
    %110 = arith.mulf %109, %109 : vector<48x32xf32>
    %cst_43 = arith.constant dense<0.000000e+00> : vector<48x32xf32>
    %111 = tpu.matmul %110, %6, %cst_43 {dimension_numbers = #tpu.dot_dimension_numbers<[1], [0], [0], [1], [0, 0, 1, 1], [], []>} : vector<48x32xf32>, vector<32x32xf32>, vector<48x32xf32> -> vector<48x32xf32>
    %cst_44 = arith.constant 9.99999974E-6 : f32
    %112 = vector.broadcast %cst_44 : f32 to vector<48x32xf32>
    %113 = arith.addf %111, %112 : vector<48x32xf32>
    %114 = math.rsqrt %113 : vector<48x32xf32>
    %115 = arith.mulf %109, %114 : vector<48x32xf32>
    %116 = vector.broadcast %69 : vector<1x32xf32> to vector<48x32xf32>
    %117 = arith.mulf %115, %116 : vector<48x32xf32>
    %118 = vector.broadcast %70 : vector<1x32xf32> to vector<48x32xf32>
    %119 = arith.addf %117, %118 : vector<48x32xf32>
    %cst_45 = arith.constant dense<0.000000e+00> : vector<48x64xf32>
    %120 = tpu.matmul %119, %73, %cst_45 {dimension_numbers = #tpu.dot_dimension_numbers<[1], [0], [0], [1], [0, 0, 1, 1], [], []>} : vector<48x32xf32>, vector<32x64xf32>, vector<48x64xf32> -> vector<48x64xf32>
    %121 = vector.broadcast %74 : vector<1x64xf32> to vector<48x64xf32>
    %122 = arith.addf %120, %121 : vector<48x64xf32>
    %cst_46 = arith.constant 0.000000e+00 : f32
    %123 = vector.broadcast %cst_46 : f32 to vector<48x64xf32>
    %124 = arith.maximumf %122, %123 : vector<48x64xf32>
    %cst_47 = arith.constant dense<0.000000e+00> : vector<48x32xf32>
    %125 = tpu.matmul %124, %77, %cst_47 {dimension_numbers = #tpu.dot_dimension_numbers<[1], [0], [0], [1], [0, 0, 1, 1], [], []>} : vector<48x64xf32>, vector<64x32xf32>, vector<48x32xf32> -> vector<48x32xf32>
    %126 = vector.broadcast %78 : vector<1x32xf32> to vector<48x32xf32>
    %127 = arith.addf %125, %126 : vector<48x32xf32>
    %128 = arith.addf %119, %127 : vector<48x32xf32>
    %cst_48 = arith.constant dense<0.000000e+00> : vector<48x32xf32>
    %129 = tpu.matmul %128, %6, %cst_48 {dimension_numbers = #tpu.dot_dimension_numbers<[1], [0], [0], [1], [0, 0, 1, 1], [], []>} : vector<48x32xf32>, vector<32x32xf32>, vector<48x32xf32> -> vector<48x32xf32>
    %130 = arith.subf %128, %129 : vector<48x32xf32>
    %131 = arith.mulf %130, %130 : vector<48x32xf32>
    %cst_49 = arith.constant dense<0.000000e+00> : vector<48x32xf32>
    %132 = tpu.matmul %131, %6, %cst_49 {dimension_numbers = #tpu.dot_dimension_numbers<[1], [0], [0], [1], [0, 0, 1, 1], [], []>} : vector<48x32xf32>, vector<32x32xf32>, vector<48x32xf32> -> vector<48x32xf32>
    %cst_50 = arith.constant 9.99999974E-6 : f32
    %133 = vector.broadcast %cst_50 : f32 to vector<48x32xf32>
    %134 = arith.addf %132, %133 : vector<48x32xf32>
    %135 = math.rsqrt %134 : vector<48x32xf32>
    %136 = arith.mulf %130, %135 : vector<48x32xf32>
    %137 = vector.broadcast %79 : vector<1x32xf32> to vector<48x32xf32>
    %138 = arith.mulf %136, %137 : vector<48x32xf32>
    %139 = vector.broadcast %80 : vector<1x32xf32> to vector<48x32xf32>
    %140 = arith.addf %138, %139 : vector<48x32xf32>
    %c13 = arith.constant 13 : index
    %c0_51 = arith.constant 0 : index
    %c0_52 = arith.constant 0 : index
    %141 = vector.load %arg3[%c13, %c0_51, %c0_52] : memref<17x64x128xf32, #tpu.memory_space<vmem>>, vector<1x64x128xf32>
    %142 = vector.shape_cast %141 : vector<1x64x128xf32> to vector<64x128xf32>
    %143 = vector.extract_strided_slice %142 {offsets = [0, 0], sizes = [32, 96], strides = [1, 1]} : vector<64x128xf32> to vector<32x96xf32>
    %144 = vector.extract_strided_slice %0 {offsets = [16, 0], sizes = [1, 96], strides = [1, 1]} : vector<24x128xf32> to vector<1x96xf32>
    %c14 = arith.constant 14 : index
    %c0_53 = arith.constant 0 : index
    %c0_54 = arith.constant 0 : index
    %145 = vector.load %arg3[%c14, %c0_53, %c0_54] : memref<17x64x128xf32, #tpu.memory_space<vmem>>, vector<1x64x128xf32>
    %146 = vector.shape_cast %145 : vector<1x64x128xf32> to vector<64x128xf32>
    %147 = vector.extract_strided_slice %146 {offsets = [0, 0], sizes = [32, 32], strides = [1, 1]} : vector<64x128xf32> to vector<32x32xf32>
    %148 = vector.extract_strided_slice %0 {offsets = [17, 0], sizes = [1, 32], strides = [1, 1]} : vector<24x128xf32> to vector<1x32xf32>
    %149 = vector.extract_strided_slice %0 {offsets = [18, 0], sizes = [1, 32], strides = [1, 1]} : vector<24x128xf32> to vector<1x32xf32>
    %150 = vector.extract_strided_slice %0 {offsets = [19, 0], sizes = [1, 32], strides = [1, 1]} : vector<24x128xf32> to vector<1x32xf32>
    %c15 = arith.constant 15 : index
    %c0_55 = arith.constant 0 : index
    %c0_56 = arith.constant 0 : index
    %151 = vector.load %arg3[%c15, %c0_55, %c0_56] : memref<17x64x128xf32, #tpu.memory_space<vmem>>, vector<1x64x128xf32>
    %152 = vector.shape_cast %151 : vector<1x64x128xf32> to vector<64x128xf32>
    %153 = vector.extract_strided_slice %152 {offsets = [0, 0], sizes = [32, 64], strides = [1, 1]} : vector<64x128xf32> to vector<32x64xf32>
    %154 = vector.extract_strided_slice %0 {offsets = [20, 0], sizes = [1, 64], strides = [1, 1]} : vector<24x128xf32> to vector<1x64xf32>
    %c16 = arith.constant 16 : index
    %c0_57 = arith.constant 0 : index
    %c0_58 = arith.constant 0 : index
    %155 = vector.load %arg3[%c16, %c0_57, %c0_58] : memref<17x64x128xf32, #tpu.memory_space<vmem>>, vector<1x64x128xf32>
    %156 = vector.shape_cast %155 : vector<1x64x128xf32> to vector<64x128xf32>
    %157 = vector.extract_strided_slice %156 {offsets = [0, 0], sizes = [64, 32], strides = [1, 1]} : vector<64x128xf32> to vector<64x32xf32>
    %158 = vector.extract_strided_slice %0 {offsets = [21, 0], sizes = [1, 32], strides = [1, 1]} : vector<24x128xf32> to vector<1x32xf32>
    %159 = vector.extract_strided_slice %0 {offsets = [22, 0], sizes = [1, 32], strides = [1, 1]} : vector<24x128xf32> to vector<1x32xf32>
    %160 = vector.extract_strided_slice %0 {offsets = [23, 0], sizes = [1, 32], strides = [1, 1]} : vector<24x128xf32> to vector<1x32xf32>
    %cst_59 = arith.constant dense<0.000000e+00> : vector<48x96xf32>
    %161 = tpu.matmul %140, %143, %cst_59 {dimension_numbers = #tpu.dot_dimension_numbers<[1], [0], [0], [1], [0, 0, 1, 1], [], []>} : vector<48x32xf32>, vector<32x96xf32>, vector<48x96xf32> -> vector<48x96xf32>
    %162 = vector.broadcast %144 : vector<1x96xf32> to vector<48x96xf32>
    %163 = arith.addf %161, %162 : vector<48x96xf32>
    %164 = vector.extract_strided_slice %163 {offsets = [0, 0], sizes = [48, 32], strides = [1, 1]} : vector<48x96xf32> to vector<48x32xf32>
    %165 = vector.extract_strided_slice %163 {offsets = [0, 32], sizes = [48, 64], strides = [1, 1]} : vector<48x96xf32> to vector<48x64xf32>
    %cst_60 = arith.constant dense<0.000000e+00> : vector<48x64xf32>
    %166 = tpu.matmul %12, %165, %cst_60 {dimension_numbers = #tpu.dot_dimension_numbers<[1], [0], [0], [1], [0, 0, 1, 1], [], []>} : vector<48x48xf32>, vector<48x64xf32>, vector<48x64xf32> -> vector<48x64xf32>
    %167 = vector.extract_strided_slice %165 {offsets = [0, 0], sizes = [48, 32], strides = [1, 1]} : vector<48x64xf32> to vector<48x32xf32>
    %168 = vector.extract_strided_slice %165 {offsets = [0, 32], sizes = [48, 32], strides = [1, 1]} : vector<48x64xf32> to vector<48x32xf32>
    %169 = vector.extract_strided_slice %166 {offsets = [0, 0], sizes = [48, 32], strides = [1, 1]} : vector<48x64xf32> to vector<48x32xf32>
    %170 = vector.extract_strided_slice %166 {offsets = [0, 32], sizes = [48, 32], strides = [1, 1]} : vector<48x64xf32> to vector<48x32xf32>
    %171 = arith.subf %167, %169 : vector<48x32xf32>
    %172 = arith.mulf %164, %171 : vector<48x32xf32>
    %cst_61 = arith.constant dense<0.000000e+00> : vector<48x32xf32>
    %173 = tpu.matmul %172, %9, %cst_61 {dimension_numbers = #tpu.dot_dimension_numbers<[1], [0], [0], [1], [0, 0, 1, 1], [], []>} : vector<48x32xf32>, vector<32x32xf32>, vector<48x32xf32> -> vector<48x32xf32>
    %cst_62 = arith.constant 0.176776692 : f32
    %174 = vector.broadcast %cst_62 : f32 to vector<48x32xf32>
    %175 = arith.mulf %173, %174 : vector<48x32xf32>
    %176 = math.tanh %175 : vector<48x32xf32>
    %cst_63 = arith.constant 5.000000e-01 : f32
    %177 = vector.broadcast %cst_63 : f32 to vector<48x32xf32>
    %178 = arith.mulf %177, %176 : vector<48x32xf32>
    %cst_64 = arith.constant 5.000000e-01 : f32
    %179 = vector.broadcast %cst_64 : f32 to vector<48x32xf32>
    %180 = arith.addf %178, %179 : vector<48x32xf32>
    %181 = arith.subf %168, %170 : vector<48x32xf32>
    %182 = arith.mulf %180, %181 : vector<48x32xf32>
    %183 = arith.addf %170, %182 : vector<48x32xf32>
    %cst_65 = arith.constant dense<0.000000e+00> : vector<48x32xf32>
    %184 = tpu.matmul %183, %147, %cst_65 {dimension_numbers = #tpu.dot_dimension_numbers<[1], [0], [0], [1], [0, 0, 1, 1], [], []>} : vector<48x32xf32>, vector<32x32xf32>, vector<48x32xf32> -> vector<48x32xf32>
    %185 = vector.broadcast %148 : vector<1x32xf32> to vector<48x32xf32>
    %186 = arith.addf %184, %185 : vector<48x32xf32>
    %187 = arith.addf %140, %186 : vector<48x32xf32>
    %cst_66 = arith.constant dense<0.000000e+00> : vector<48x32xf32>
    %188 = tpu.matmul %187, %6, %cst_66 {dimension_numbers = #tpu.dot_dimension_numbers<[1], [0], [0], [1], [0, 0, 1, 1], [], []>} : vector<48x32xf32>, vector<32x32xf32>, vector<48x32xf32> -> vector<48x32xf32>
    %189 = arith.subf %187, %188 : vector<48x32xf32>
    %190 = arith.mulf %189, %189 : vector<48x32xf32>
    %cst_67 = arith.constant dense<0.000000e+00> : vector<48x32xf32>
    %191 = tpu.matmul %190, %6, %cst_67 {dimension_numbers = #tpu.dot_dimension_numbers<[1], [0], [0], [1], [0, 0, 1, 1], [], []>} : vector<48x32xf32>, vector<32x32xf32>, vector<48x32xf32> -> vector<48x32xf32>
    %cst_68 = arith.constant 9.99999974E-6 : f32
    %192 = vector.broadcast %cst_68 : f32 to vector<48x32xf32>
    %193 = arith.addf %191, %192 : vector<48x32xf32>
    %194 = math.rsqrt %193 : vector<48x32xf32>
    %195 = arith.mulf %189, %194 : vector<48x32xf32>
    %196 = vector.broadcast %149 : vector<1x32xf32> to vector<48x32xf32>
    %197 = arith.mulf %195, %196 : vector<48x32xf32>
    %198 = vector.broadcast %150 : vector<1x32xf32> to vector<48x32xf32>
    %199 = arith.addf %197, %198 : vector<48x32xf32>
    %cst_69 = arith.constant dense<0.000000e+00> : vector<48x64xf32>
    %200 = tpu.matmul %199, %153, %cst_69 {dimension_numbers = #tpu.dot_dimension_numbers<[1], [0], [0], [1], [0, 0, 1, 1], [], []>} : vector<48x32xf32>, vector<32x64xf32>, vector<48x64xf32> -> vector<48x64xf32>
    %201 = vector.broadcast %154 : vector<1x64xf32> to vector<48x64xf32>
    %202 = arith.addf %200, %201 : vector<48x64xf32>
    %cst_70 = arith.constant 0.000000e+00 : f32
    %203 = vector.broadcast %cst_70 : f32 to vector<48x64xf32>
    %204 = arith.maximumf %202, %203 : vector<48x64xf32>
    %cst_71 = arith.constant dense<0.000000e+00> : vector<48x32xf32>
    %205 = tpu.matmul %204, %157, %cst_71 {dimension_numbers = #tpu.dot_dimension_numbers<[1], [0], [0], [1], [0, 0, 1, 1], [], []>} : vector<48x64xf32>, vector<64x32xf32>, vector<48x32xf32> -> vector<48x32xf32>
    %206 = vector.broadcast %158 : vector<1x32xf32> to vector<48x32xf32>
    %207 = arith.addf %205, %206 : vector<48x32xf32>
    %208 = arith.addf %199, %207 : vector<48x32xf32>
    %cst_72 = arith.constant dense<0.000000e+00> : vector<48x32xf32>
    %209 = tpu.matmul %208, %6, %cst_72 {dimension_numbers = #tpu.dot_dimension_numbers<[1], [0], [0], [1], [0, 0, 1, 1], [], []>} : vector<48x32xf32>, vector<32x32xf32>, vector<48x32xf32> -> vector<48x32xf32>
    %210 = arith.subf %208, %209 : vector<48x32xf32>
    %211 = arith.mulf %210, %210 : vector<48x32xf32>
    %cst_73 = arith.constant dense<0.000000e+00> : vector<48x32xf32>
    %212 = tpu.matmul %211, %6, %cst_73 {dimension_numbers = #tpu.dot_dimension_numbers<[1], [0], [0], [1], [0, 0, 1, 1], [], []>} : vector<48x32xf32>, vector<32x32xf32>, vector<48x32xf32> -> vector<48x32xf32>
    %cst_74 = arith.constant 9.99999974E-6 : f32
    %213 = vector.broadcast %cst_74 : f32 to vector<48x32xf32>
    %214 = arith.addf %212, %213 : vector<48x32xf32>
    %215 = math.rsqrt %214 : vector<48x32xf32>
    %216 = arith.mulf %210, %215 : vector<48x32xf32>
    %217 = vector.broadcast %159 : vector<1x32xf32> to vector<48x32xf32>
    %218 = arith.mulf %216, %217 : vector<48x32xf32>
    %219 = vector.broadcast %160 : vector<1x32xf32> to vector<48x32xf32>
    %220 = arith.addf %218, %219 : vector<48x32xf32>
    %cst_75 = arith.constant dense<0.000000e+00> : vector<8x32xf32>
    %221 = tpu.matmul %21, %220, %cst_75 {dimension_numbers = #tpu.dot_dimension_numbers<[1], [0], [0], [1], [0, 0, 1, 1], [], []>} : vector<8x48xf32>, vector<48x32xf32>, vector<8x32xf32> -> vector<8x32xf32>
    %222 = vector.extract_strided_slice %0 {offsets = [5, 0], sizes = [1, 32], strides = [1, 1]} : vector<24x128xf32> to vector<1x32xf32>
    %223 = vector.extract_strided_slice %0 {offsets = [6, 0], sizes = [1, 32], strides = [1, 1]} : vector<24x128xf32> to vector<1x32xf32>
    %cst_76 = arith.constant dense<0.000000e+00> : vector<8x32xf32>
    %224 = tpu.matmul %221, %6, %cst_76 {dimension_numbers = #tpu.dot_dimension_numbers<[1], [0], [0], [1], [0, 0, 1, 1], [], []>} : vector<8x32xf32>, vector<32x32xf32>, vector<8x32xf32> -> vector<8x32xf32>
    %225 = arith.subf %221, %224 : vector<8x32xf32>
    %226 = arith.mulf %225, %225 : vector<8x32xf32>
    %cst_77 = arith.constant dense<0.000000e+00> : vector<8x32xf32>
    %227 = tpu.matmul %226, %6, %cst_77 {dimension_numbers = #tpu.dot_dimension_numbers<[1], [0], [0], [1], [0, 0, 1, 1], [], []>} : vector<8x32xf32>, vector<32x32xf32>, vector<8x32xf32> -> vector<8x32xf32>
    %cst_78 = arith.constant 9.99999974E-6 : f32
    %228 = vector.broadcast %cst_78 : f32 to vector<8x32xf32>
    %229 = arith.addf %227, %228 : vector<8x32xf32>
    %230 = math.rsqrt %229 : vector<8x32xf32>
    %231 = arith.mulf %225, %230 : vector<8x32xf32>
    %232 = vector.broadcast %222 : vector<1x32xf32> to vector<8x32xf32>
    %233 = arith.mulf %231, %232 : vector<8x32xf32>
    %234 = vector.broadcast %223 : vector<1x32xf32> to vector<8x32xf32>
    %235 = arith.addf %233, %234 : vector<8x32xf32>
    %c1 = arith.constant 1 : index
    %c0_79 = arith.constant 0 : index
    %c0_80 = arith.constant 0 : index
    %236 = vector.load %arg3[%c1, %c0_79, %c0_80] : memref<17x64x128xf32, #tpu.memory_space<vmem>>, vector<1x64x128xf32>
    %237 = vector.shape_cast %236 : vector<1x64x128xf32> to vector<64x128xf32>
    %238 = vector.extract_strided_slice %237 {offsets = [0, 0], sizes = [32, 128], strides = [1, 1]} : vector<64x128xf32> to vector<32x128xf32>
    %239 = vector.extract_strided_slice %0 {offsets = [7, 0], sizes = [1, 128], strides = [1, 1]} : vector<24x128xf32> to vector<1x128xf32>
    %cst_81 = arith.constant dense<0.000000e+00> : vector<8x128xf32>
    %240 = tpu.matmul %235, %238, %cst_81 {dimension_numbers = #tpu.dot_dimension_numbers<[1], [0], [0], [1], [0, 0, 1, 1], [], []>} : vector<8x32xf32>, vector<32x128xf32>, vector<8x128xf32> -> vector<8x128xf32>
    %241 = vector.broadcast %239 : vector<1x128xf32> to vector<8x128xf32>
    %242 = arith.addf %240, %241 : vector<8x128xf32>
    %c0_82 = arith.constant 0 : index
    %c0_83 = arith.constant 0 : index
    %243 = vector.load %arg4[%c0_82, %c0_83] : memref<8x128xf32, #tpu.memory_space<vmem>>, vector<8x128xf32>
    tpu.vector_store %arg4[%c0_82, %c0_83], %242 {strides = array<i32>} : memref<8x128xf32, #tpu.memory_space<vmem>>, vector<8x128xf32>,
    return
  }
  func.func @transform_0(%arg0: i32) -> (i32, i32) {
    %c0_i32 = arith.constant 0 : i32
    %c0_i32_0 = arith.constant 0 : i32
    return %arg0, %c0_i32 : i32, i32
  }
  func.func @transform_1(%arg0: i32) -> (i32, i32) {
    %c0_i32 = arith.constant 0 : i32
    %c0_i32_0 = arith.constant 0 : i32
    %c0_i32_1 = arith.constant 0 : i32
    return %c0_i32, %c0_i32_0 : i32, i32
  }
  func.func @transform_2(%arg0: i32) -> (i32, i32, i32) {
    %c0_i32 = arith.constant 0 : i32
    %c0_i32_0 = arith.constant 0 : i32
    %c0_i32_1 = arith.constant 0 : i32
    %c0_i32_2 = arith.constant 0 : i32
    return %c0_i32, %c0_i32_0, %c0_i32_1 : i32, i32, i32
  }
  func.func @transform_3(%arg0: i32) -> (i32, i32) {
    %c0_i32 = arith.constant 0 : i32
    %c0_i32_0 = arith.constant 0 : i32
    return %arg0, %c0_i32 : i32, i32
  }
}

</mosaic_0001>

<bundles_post_ra>
// kernel: vit_forward.1
= control target key start
LH: loop header
LB: loop body
LE: loop exit
PB: predicated region body
PF: predicated region fallthrough
CT: control target
= control target key end

     0   :  { %s5291_s12 = smov 0   ;;  %s6333_s0 = inlined_call_operand.vmem [shape: f32[128,128], index: 0, kind: input, shape index: {}]   ;;  %s6334_s1 = inlined_call_operand.vmem [shape: f32[24,128], index: 1, kind: input, shape index: {}]   ;;  %s6335_s2 = inlined_call_operand.vmem [shape: f32[17,64,128], index: 2, kind: input, shape index: {}]   ;;  %s6336_s3 = inlined_call_operand.vmem [shape: f32[32,128], index: 3, kind: output, shape index: {}]  }
   0x1 LB: > { %s5297_s13 = sadd.s32 4294967295, %s5264_s12   ;;  %p4147_p0 = scmp.ge.s32.totalorder %s5264_s12, 1  ;;  %s5264_s12 = sphi %s5291_s12, %s13_s12  }
   0x2   : > { %p138_p1 = scmp.lt.s32.totalorder %s5264_s12, 5 }
   0x4   : > { %p139_p2 = pnand %p4147_p0, %p138_p1 }
   0x5   : > { %s4148_s18 = sshll.u32 (!%p139_p2), %s5297_s13, 2  ;;  %s5266_s21 = smov (!%p139_p2), 96  }
   0x6   : > { %142 = sbr.rel (%p139_p2) target bundleno = 7369 (0x1cc9), region = 32  ;;  %p162_p3 = scmp.lt.s32.totalorder (!%p139_p2), %s4148_s18, 15 }
   0x7   : > { %s5267_s7 = smov (!%p139_p2), 32   ;;  %p167_p4 = scmp.lt.s32.totalorder (!%p139_p2), %s5297_s13, 3 }
   0xb   : > { %v4152_v0 = vld [vmem:[%s6335_s2 + $0x148] sm:$0xff]  ;;  %v4151_v1 = vld [vmem:[%s6335_s2 + $0x140] sm:$0xff]  ;;  %s6338_s18 = smov (!%p162_p3, %s4148_s18), 15  ;;  %vm214_vm0 = vcmask 130048   ;;  %v5328_v20 = vld [vmem:[%s6335_s2 + $0x198] sm:$0xff]  ;;  %v425_v25 = vlaneseq  ;;  %vm544_vm1 = vcmask 261120  }
   0xc   : > { %4654 = vmatprep.subr.mxu0 %v4152_v0  ;;  %4664 = vmatprep.subr.mxu1 %v4152_v0  ;;  %s4149_s19 = sshll.u32 %s6338_s18, 3  ;;  %v442_v18 = vld [vmem:[%s6335_s2 + $0x8] sm:$0xff]  ;;  %v441_v19 = vld [vmem:[%s6335_s2] sm:$0xff]  ;;  %v5358_v52 = vld [vmem:[%s6335_s2 + $0x190] sm:$0xff]  ;;  %vm1055_vm2 = vcmask 392192   ;;  %s5268_s18 = smov 64  }
   0xd   : > { %4655 = vmatpush3.msra.mxu0 %v4152_v0  ;;  %4665 = vmatpush3.msra.mxu1 %v4152_v0  ;;  %s165_s22 = scalar_lea.vmem %s6333_s0, %s4149_s19  ;;  %v5333_v30 = vshrl.u32 %v425_v25, 7  ;;  %v5341_v32 = vld [vmem:[%s6334_s1] sm:$0xff]  ;;  %v5366_v53 = vld [vmem:[%s6335_s2 + $0x188] sm:$0xff]  ;;  %vm1952_vm3 = vcmask 523264   ;;  %vm5270_vm4 = vmmov 0   ;;  %s6340_s13 = smov (!%p167_p4, %s5297_s13), 3 }
   0xe   : > { %4656 = vmatprep.subr.mxu0 %v4151_v1  ;;  %4666 = vmatprep.subr.mxu1 %v4151_v1  ;;  %v210_v2 = vld [vmem:[%s165_s22] sm:$0xff]  ;;  %v211_v3 = vld [vmem:[%s165_s22 + $0x8] sm:$0xff]  ;;  %v212_v4 = vld [vmem:[%s165_s22 + $0x10] sm:$0xff]  ;;  %s4150_s11 = sshll.u32 %s6340_s13, 3 }
   0xf   : > { %4657 = vmatpush3.msra.mxu0 %v4151_v1  ;;  %4667 = vmatpush3.msra.mxu1 %v4151_v1  ;;  %v213_v5 = vld [vmem:[%s165_s22 + $0x18] sm:$0xff]  ;;  %v5336_v31 = vsub.s32 0, %v5333_v30  ;;  %v5346_v35 = vsub.s32 1, %v5333_v30  ;;  %v5375_v54 = vld [vmem:[%s6335_s2 + $0x180] sm:$0xff]  ;;  %v5383_v55 = vsub.s32 2, %v5333_v30  ;;  %s170_s16 = scalar_lea.vmem %s6336_s3, %s4150_s11 }
  0x10   : > { %4658 = vmatprep.mubr.msk.f32.mxu0 %vm214_vm0, %v210_v2  ;;  %4674 = vmatprep.subr.mxu0 %v442_v18 }
  0x11   : > { %4659 = vmatmul.mubr.msk.f32.vlgmr.msra.gmra.mxu0 %vm214_vm0, %v211_v3  ;;  %4684 = vmatprep.subr.mxu1 %v5328_v20  ;;  %v428_v34 = vrot.slane %v5341_v32, %v5336_v31  ;;  %v436_v41 = vrot.slane %v5341_v32, %v5346_v35  ;;  %v446_v56 = vrot.slane %v5341_v32, %v5383_v55 }
  0x12   : > { %4661 = vmatprep.mubr.msk.f32.mxu0 %vm214_vm0, %v212_v4  ;;  %4675 = vmatpush3.msra.mxu0 %v442_v18 }
  0x13   : > { %4676 = vmatprep.subr.mxu0 %v441_v19 }
  0x14   : > { %4677 = vmatpush3.msra.mxu0 %v441_v19 }
  0x15   : > { %4662 = vmatmul.mubr.msk.f32.gmra.mxu0 %vm214_vm0, %v213_v5  ;;  %4698 = vmatprep.subr.mxu0 %v5328_v20 }
  0xd1   : > { %v4660_v6 = vpop.f32.mrf.mxu0 }
  0xd2   : > { %v313_v7 = vsub.f32 %v211_v3, %v4660_v6 }
  0xd3   : > { %v293_v8 = vpop.f32.mrf.mxu0 }
  0xd4   : > { %v312_v9 = vsub.f32 %v210_v2, %v293_v8  ;;  %v317_v12 = vmul.f32 %v313_v7, %v313_v7 }
  0xd5   : > { %v4663_v10 = vpop.f32.mrf.mxu0 }
  0xd6   : > { %v316_v11 = vmul.f32 %v312_v9, %v312_v9  ;;  %v315_v13 = vsub.f32 %v213_v5, %v4663_v10 }
  0xd7   : > { %v303_v14 = vpop.f32.mrf.mxu0 }
  0xd8   : > { %v314_v15 = vsub.f32 %v212_v4, %v303_v14  ;;  %4668 = vmatprep.mubr.msk.f32.mxu1 %vm214_vm0, %v316_v11  ;;  %v319_v17 = vmul.f32 %v315_v13, %v315_v13  ;;  %v4209_v14 = vld [vmem:[%s6335_s2 + $0x258] sm:$0xff] }
  0xd9   : > { %4669 = vmatmul.mubr.msk.f32.vlgmr.msra.gmra.mxu1 %vm214_vm0, %v317_v12 }
  0xda   : > { %v318_v16 = vmul.f32 %v314_v15, %v314_v15  ;;  %4685 = vmatpush3.msra.mxu1 %v5328_v20 }
  0xdb   : > { %4686 = vmatprep.subr.mxu1 %v5358_v52 }
  0xdc   : > { %4671 = vmatprep.mubr.msk.f32.mxu1 %vm214_vm0, %v318_v16  ;;  %4687 = vmatpush3.msra.mxu1 %v5358_v52 }
  0xdd   : > { %4672 = vmatmul.mubr.msk.f32.gmra.mxu1 %vm214_vm0, %v319_v17  ;;  %4688 = vmatprep.subr.mxu1 %v5366_v53 }
  0xde   : > { %4689 = vmatpush3.msra.mxu1 %v5366_v53 }
  0xdf   : > { %4690 = vmatprep.subr.mxu1 %v5375_v54 }
  0xe0   : > { %4691 = vmatpush3.msra.mxu1 %v5375_v54 }
 0x199   : > { %v4670_v21 = vpop.f32.mrf.mxu1 }
 0x19a   : > { %v404_v22 = vadd.f32 1e-05, %v4670_v21 }
 0x19b   : > { %v398_v23 = vpop.f32.mrf.mxu1 }
 0x19c   : > { %5154 = vrsqrt.f32 %v404_v22  ;;  %v399_v24 = vadd.f32 1e-05, %v398_v23 }
 0x19d   : > { %v4673_v26 = vpop.f32.mrf.mxu1 }
 0x19e   : > { %5156 = vrsqrt.f32 %v399_v24  ;;  %v414_v27 = vadd.f32 1e-05, %v4673_v26  ;;  %v5403_v24 = vsub.s32 3, %v5333_v30 }
 0x19f   : > { %v408_v28 = vpop.f32.mrf.mxu1 }
 0x1a0   : > { %5158 = vrsqrt.f32 %v414_v27  ;;  %v409_v29 = vadd.f32 1e-05, %v408_v28  ;;  %v5406_v27 = vsub.s32 4, %v5333_v30 }
 0x1a2   : > { %5160 = vrsqrt.f32 %v409_v29 }
 0x1a9   : > { %v5155_v33 = vpop.eup %5154 }
 0x1aa   : > { %v422_v36 = vmul.f32 %v5155_v33, %v313_v7  ;;  %v758_v33 = vrot.slane %v5341_v32, %v5403_v24 }
 0x1ab   : > { %v5157_v37 = vpop.eup %5156 }
 0x1ac   : > { %v421_v38 = vmul.f32 %v5157_v37, %v312_v9  ;;  %v430_v40 = vmul.f32 %v428_v34, %v422_v36 }
 0x1ad   : > { %v5159_v39 = vpop.eup %5158 }
 0x1ae   : > { %v429_v42 = vmul.f32 %v428_v34, %v421_v38  ;;  %v424_v43 = vmul.f32 %v5159_v39, %v315_v13  ;;  %v438_v47 = vadd.f32 %v436_v41, %v430_v40  ;;  %v4167_v13 = vld [vmem:[%s6335_s2 + $0x80] sm:$0xff]  ;;  %v766_v38 = vrot.slane %v5341_v32, %v5406_v27  ;;  %v4169_v32 = vld [vmem:[%s6335_s2 + $0x90] sm:$0xff] }
 0x1af   : > { %v5161_v44 = vpop.eup %5160 }
 0x1b0   : > { %v437_v45 = vadd.f32 %v436_v41, %v429_v42  ;;  %v423_v46 = vmul.f32 %v5161_v44, %v314_v15  ;;  %v432_v48 = vmul.f32 %v428_v34, %v424_v43 }
 0x1b2   : > { %4678 = vmatprep.mubr.msk.f32.mxu0 %vm214_vm0, %v437_v45  ;;  %v431_v49 = vmul.f32 %v428_v34, %v423_v46  ;;  %v440_v51 = vadd.f32 %v436_v41, %v432_v48  ;;  %v4168_v48 = vld [vmem:[%s6335_s2 + $0x88] sm:$0xff] }
 0x1b3   : > { %4679 = vmatmul.mubr.msk.f32.vlgmr.msra.gmra.mxu0 %vm214_vm0, %v438_v47 }
 0x1b4   : > { %v439_v50 = vadd.f32 %v436_v41, %v431_v49  ;;  %4699 = vmatpush3.msra.mxu0 %v5328_v20  ;;  %v4170_v49 = vld [vmem:[%s6335_s2 + $0x98] sm:$0xff] }
 0x1b5   : > { %4700 = vmatprep.subr.mxu0 %v5358_v52 }
 0x1b6   : > { %4681 = vmatprep.mubr.msk.f32.mxu0 %vm214_vm0, %v439_v50  ;;  %4701 = vmatpush3.msra.mxu0 %v5358_v52  ;;  %v4171_v50 = vld [vmem:[%s6335_s2 + $0xa0] sm:$0xff] }
 0x1b7   : > { %4682 = vmatmul.mubr.msk.f32.gmra.mxu0 %vm214_vm0, %v440_v51  ;;  %4702 = vmatprep.subr.mxu0 %v5366_v53  ;;  %v4172_v51 = vld [vmem:[%s6335_s2 + $0xa8] sm:$0xff] }
 0x1b8   : > { %4703 = vmatpush3.msra.mxu0 %v5366_v53 }
 0x1b9   : > { %4704 = vmatprep.subr.mxu0 %v5375_v54 }
 0x1ba   : > { %4705 = vmatpush3.msra.mxu0 %v5375_v54 }
 0x1bb   : > { %4729 = vmatprep.subr.mxu0 %v4209_v14 }
 0x273   : > { %v4680_v57 = vpop.f32.mrf.mxu0 }
 0x274   : > { %v531_v60 = vadd.f32 %v4680_v57, %v446_v56  ;;  %v4207_v57 = vld [vmem:[%s6335_s2 + $0x248] sm:$0xff] }
 0x275   : > { %v525_v58 = vpop.f32.mrf.mxu0 }
 0x276   : > { %v526_v59 = vadd.f32 %v525_v58, %v446_v56  ;;  %v4206_v58 = vld [vmem:[%s6335_s2 + $0x240] sm:$0xff] }
 0x277   : > { %v4683_v61 = vpop.f32.mrf.mxu0 }
 0x278   : > { %4692 = vmatprep.mubr.msk.f32.mxu1 %vm544_vm1, %v526_v59  ;;  %v541_v0 = vadd.f32 %v4683_v61, %v446_v56  ;;  %v4174_v61 = vld [vmem:[%s6335_s2 + $0x1c8] sm:$0xff] }
 0x279   : > { %v535_v62 = vpop.f32.mrf.mxu0  ;;  %4693 = vmatmul.mubr.msk.f32.vlgmr.msra.gmra.mxu1 %vm544_vm1, %v531_v60 }
 0x27a   : > { %v536_v63 = vadd.f32 %v535_v62, %v446_v56  ;;  %v4208_v56 = vld [vmem:[%s6335_s2 + $0x250] sm:$0xff] }
 0x27c   : > { %4695 = vmatprep.mubr.msk.f32.mxu1 %vm544_vm1, %v536_v63 }
 0x27d   : > { %4696 = vmatmul.mubr.msk.f32.gmra.mxu1 %vm544_vm1, %v541_v0 }
 0x27e   : > { %4720 = vmatprep.mubr.msk.f32.mxu1 %vm544_vm1, %v4167_v13  ;;  %v5486_v13 = vld [vmem:[%s6334_s1 + $0x8] sm:$0xff] }
 0x339   : > { %v4694_v1 = vpop.f32.mrf.mxu1 }
 0x33a   : > { %v643_v2 = vsub.f32 %v531_v60, %v4694_v1  ;;  %v4173_v60 = vld [vmem:[%s6335_s2 + $0x1c0] sm:$0xff] }
 0x33b   : > { %v623_v3 = vpop.f32.mrf.mxu1 }
 0x33c   : > { %v642_v4 = vsub.f32 %v526_v59, %v623_v3  ;;  %v647_v7 = vmul.f32 %v643_v2, %v643_v2  ;;  %v4176_v3 = vld [vmem:[%s6335_s2 + $0x1d8] sm:$0xff] }
 0x33d   : > { %v4697_v5 = vpop.f32.mrf.mxu1 }
 0x33e   : > { %v646_v6 = vmul.f32 %v642_v4, %v642_v4  ;;  %v645_v8 = vsub.f32 %v541_v0, %v4697_v5 }
 0x33f   : > { %v633_v9 = vpop.f32.mrf.mxu1 }
 0x340   : > { %v644_v10 = vsub.f32 %v536_v63, %v633_v9  ;;  %4706 = vmatprep.mubr.msk.f32.mxu0 %vm544_vm1, %v646_v6  ;;  %v649_v12 = vmul.f32 %v645_v8, %v645_v8  ;;  %v4178_v9 = vld [vmem:[%s6335_s2 + $0x1e8] sm:$0xff] }
 0x341   : > { %4707 = vmatmul.mubr.msk.f32.vlgmr.msra.gmra.mxu0 %vm544_vm1, %v647_v7 }
 0x342   : > { %v648_v11 = vmul.f32 %v644_v10, %v644_v10  ;;  %4730 = vmatpush3.msra.mxu0 %v4209_v14 }
 0x343   : > { %4731 = vmatprep.subr.mxu0 %v4208_v56 }
 0x344   : > { %4709 = vmatprep.mubr.msk.f32.mxu0 %vm544_vm1, %v648_v11  ;;  %4732 = vmatpush3.msra.mxu0 %v4208_v56  ;;  %v5573_v56 = vld [vmem:[%s6335_s2 + $0x110] sm:$0xff] }
 0x345   : > { %4710 = vmatmul.mubr.msk.f32.gmra.mxu0 %vm544_vm1, %v649_v12  ;;  %4733 = vmatprep.subr.mxu0 %v4207_v57 }
 0x346   : > { %4734 = vmatpush3.msra.mxu0 %v4207_v57  ;;  %v5580_v57 = vld [vmem:[%s6335_s2 + $0x108] sm:$0xff] }
 0x347   : > { %4735 = vmatprep.subr.mxu0 %v4206_v58 }
 0x348   : > { %4736 = vmatpush3.msra.mxu0 %v4206_v58  ;;  %v5589_v58 = vld [vmem:[%s6335_s2 + $0x100] sm:$0xff] }
 0x401   : > { %v4708_v15 = vpop.f32.mrf.mxu0 }
 0x402   : > { %v734_v16 = vadd.f32 1e-05, %v4708_v15 }
 0x403   : > { %v728_v17 = vpop.f32.mrf.mxu0 }
 0x404   : > { %v729_v18 = vadd.f32 1e-05, %v728_v17  ;;  %5162 = vrsqrt.f32 %v734_v16  ;;  %v917_v16 = vrot.slane %v5486_v13, %v5336_v31 }
 0x405   : > { %v4711_v19 = vpop.f32.mrf.mxu0 }
 0x406   : > { %v744_v21 = vadd.f32 1e-05, %v4711_v19  ;;  %5164 = vrsqrt.f32 %v729_v18 }
 0x407   : > { %v738_v22 = vpop.f32.mrf.mxu0 }
 0x408   : > { %5166 = vrsqrt.f32 %v744_v21  ;;  %v739_v23 = vadd.f32 1e-05, %v738_v22 }
 0x40a   : > { %5168 = vrsqrt.f32 %v739_v23 }
 0x411   : > { %v5163_v25 = vpop.eup %5162 }
 0x412   : > { %v752_v34 = vmul.f32 %v5163_v25, %v643_v2  ;;  %v4175_v2 = vld [vmem:[%s6335_s2 + $0x1d0] sm:$0xff] }
 0x413   : > { %v5165_v26 = vpop.eup %5164 }
 0x414   : > { %v751_v40 = vmul.f32 %v5165_v26, %v642_v4  ;;  %v760_v43 = vmul.f32 %v758_v33, %v752_v34  ;;  %v5501_v26 = vld [vmem:[%s6335_s2 + $0xc0] sm:$0xff] }
 0x415   : > { %v5167_v28 = vpop.eup %5166 }
 0x416   : > { %v754_v29 = vmul.f32 %v5167_v28, %v645_v8  ;;  %v759_v45 = vmul.f32 %v758_v33, %v751_v40  ;;  %v768_v46 = vadd.f32 %v766_v38, %v760_v43  ;;  %v4177_v8 = vld [vmem:[%s6335_s2 + $0x1e0] sm:$0xff]  ;;  %v4164_v43 = vld [vmem:[%s6335_s2 + $0xd8] sm:$0xff] }
 0x417   : > { %v5169_v36 = vpop.eup %5168 }
 0x418   : > { %v762_v37 = vmul.f32 %v758_v33, %v754_v29  ;;  %v753_v39 = vmul.f32 %v5169_v36, %v644_v10  ;;  %v767_v47 = vadd.f32 %v766_v38, %v759_v45  ;;  %v4166_v45 = vld [vmem:[%s6335_s2 + $0xe8] sm:$0xff] }
 0x41a   : > { %v770_v41 = vadd.f32 %v766_v38, %v762_v37  ;;  %v761_v42 = vmul.f32 %v758_v33, %v753_v39 }
 0x41c   : > { %4712 = vmatprep.subr.mxu1 %v770_v41  ;;  %v769_v44 = vadd.f32 %v766_v38, %v761_v42  ;;  %v4163_v42 = vld [vmem:[%s6335_s2 + $0xd0] sm:$0xff] }
 0x41d   : > { %4713 = vmatpush3.msra.mxu1 %v770_v41  ;;  %v4162_v41 = vld [vmem:[%s6335_s2 + $0xc8] sm:$0xff] }
 0x41e   : > { %4714 = vmatprep.subr.mxu1 %v769_v44 }
 0x41f   : > { %4715 = vmatpush3.msra.mxu1 %v769_v44  ;;  %v4165_v44 = vld [vmem:[%s6335_s2 + $0xe0] sm:$0xff] }
 0x420   : > { %4716 = vmatprep.subr.mxu1 %v768_v46 }
 0x421   : > { %4717 = vmatpush3.msra.mxu1 %v768_v46 }
 0x422   : > { %4718 = vmatprep.subr.mxu1 %v767_v47 }
 0x423   : > { %4719 = vmatpush3.msra.mxu1 %v767_v47 }
 0x424   : > { %4721 = vmatmul.mubr.msk.f32.vlgmr.msra.gmra.mxu1 %vm544_vm1, %v4168_v48 }
 0x425   : > { %4723 = vmatprep.mubr.msk.f32.mxu1 %vm544_vm1, %v4169_v32 }
 0x428   : > { %4724 = vmatmul.mubr.msk.f32.gmra.mxu1 %vm544_vm1, %v4170_v49 }
 0x429   : > { %4726 = vmatprep.mubr.msk.f32.mxu1 %vm544_vm1, %v4171_v50 }
 0x42c   : > { %4727 = vmatmul.mubr.msk.f32.gmra.mxu1 %vm544_vm1, %v4172_v51  ;;  %v5568_v51 = vld [vmem:[%s6335_s2 + $0x118] sm:$0xff] }
 0x42d   : > { %4758 = vmatprep.mubr.msk.f32.mxu1 %vm1055_vm2, %v5501_v26  ;;  %4767 = vmatprep.subr.mxu0 %v5568_v51 }
 0x4e4   : > { %v4722_v59 = vpop.f32.mrf.mxu1 }
 0x4e5   : > { %v5449_v0 = vadd.f32 %v4722_v59, %v4174_v61 }
 0x4e6   : > { %v855_v62 = vpop.f32.mrf.mxu1 }
 0x4e7   : > { %v5447_v63 = vadd.f32 %v4173_v60, %v855_v62 }
 0x4e8   : > { %v4725_v1 = vpop.f32.mrf.mxu1 }
 0x4e9   : > { %4737 = vmatprep.mubr.msk.f32.mxu0 %vm544_vm1, %v5447_v63  ;;  %v5463_v6 = vadd.f32 %v4725_v1, %v4176_v3 }
 0x4ea   : > { %v865_v4 = vpop.f32.mrf.mxu1  ;;  %4738 = vmatmul.mubr.msk.f32.vlgmr.msra.gmra.mxu0 %vm544_vm1, %v5449_v0 }
 0x4eb   : > { %v5461_v5 = vadd.f32 %v4175_v2, %v865_v4  ;;  %4768 = vmatpush3.msra.mxu0 %v5568_v51 }
 0x4ec   : > { %v4728_v7 = vpop.f32.mrf.mxu1  ;;  %4769 = vmatprep.subr.mxu0 %v5573_v56 }
 0x4ed   : > { %4740 = vmatprep.mubr.msk.f32.mxu0 %vm544_vm1, %v5461_v5  ;;  %v5477_v12 = vadd.f32 %v4728_v7, %v4178_v9  ;;  %4770 = vmatpush3.msra.mxu0 %v5573_v56 }
 0x4ee   : > { %v875_v10 = vpop.f32.mrf.mxu1  ;;  %4741 = vmatmul.mubr.msk.f32.gmra.mxu0 %vm544_vm1, %v5463_v6  ;;  %4771 = vmatprep.subr.mxu0 %v5580_v57 }
 0x4ef   : > { %v5475_v11 = vadd.f32 %v4177_v8, %v875_v10  ;;  %4772 = vmatpush3.msra.mxu0 %v5580_v57 }
 0x4f0   : > { %4773 = vmatprep.subr.mxu0 %v5589_v58 }
 0x4f1   : > { %4743 = vmatprep.mubr.msk.f32.mxu0 %vm544_vm1, %v5475_v11  ;;  %4774 = vmatpush3.msra.mxu0 %v5589_v58 }
 0x4f2   : > { %4744 = vmatmul.mubr.msk.f32.gmra.mxu0 %vm544_vm1, %v5477_v12  ;;  %4801 = vmatprep.subr.mxu0 %v5328_v20 }
 0x5aa   : > { %v4739_v14 = vpop.f32.mrf.mxu0 }
 0x5ab   : > { %v5517_v33 = vadd.f32 %v4739_v14, %v917_v16 }
 0x5ac   : > { %v1002_v15 = vpop.f32.mrf.mxu0 }
 0x5ad   : > { %v5509_v28 = vadd.f32 %v1002_v15, %v917_v16 }
 0x5ae   : > { %v4742_v17 = vpop.f32.mrf.mxu0 }
 0x5af   : > { %v5490_v18 = vadd.f32 %v4742_v17, %v917_v16 }
 0x5b0   : > { %v1012_v19 = vpop.f32.mrf.mxu0 }
 0x5b1   : > { %1043 = vrot.lane.b32.xlu1 %v5490_v18, %s5266_s21  ;;  %v5494_v22 = vadd.f32 %v1012_v19, %v917_v16 }
 0x5b2   : > { %v4745_v21 = vpop.f32.mrf.mxu0 }
 0x5b3   : > { %v5496_v23 = vadd.f32 %v4745_v21, %v917_v16 }
 0x5b4   : > { %v1022_v25 = vpop.f32.mrf.mxu0 }
 0x5b5   : > { %1041 = vrot.lane.b32.xlu1 %v5494_v22, %s5266_s21  ;;  %1047 = vrot.lane.b32.xlu0 %v5496_v23, %s5266_s21  ;;  %v5511_v29 = vadd.f32 %v1022_v25, %v917_v16 }
 0x5b9   : > { %1037 = vrot.lane.b32.xlu1 %v5509_v28, %s5266_s21  ;;  %1045 = vrot.lane.b32.xlu0 %v5511_v29, %s5266_s21 }
 0x5bd   : > { %1039 = vrot.lane.b32.xlu0 %v5517_v33, %s5266_s21 }
 0x623   : > { %v1044_v34 = vpop.permute.xlu1 %1043 }
 0x627   : > { %v1048_v36 = vpop.permute.xlu0 %1047  ;;  %v1042_v38 = vpop.permute.xlu1 %1041 }
 0x628   : > { %4746 = vmatprep.subr.mxu1 %v1048_v36 }
 0x629   : > { %4747 = vmatpush3.msra.mxu1 %v1048_v36 }
 0x62b   : > { %v1046_v37 = vpop.permute.xlu0 %1045  ;;  %v1038_v40 = vpop.permute.xlu1 %1037 }
 0x62c   : > { %4748 = vmatprep.subr.mxu1 %v1046_v37 }
 0x62d   : > { %4749 = vmatpush3.msra.mxu1 %v1046_v37 }
 0x62e   : > { %4750 = vmatprep.subr.mxu1 %v1044_v34 }
 0x62f   : > { %4751 = vmatpush3.msra.mxu1 %v1044_v34  ;;  %v1040_v39 = vpop.permute.xlu0 %1039 }
 0x630   : > { %4752 = vmatprep.subr.mxu1 %v1042_v38 }
 0x631   : > { %4753 = vmatpush3.msra.mxu1 %v1042_v38 }
 0x632   : > { %4754 = vmatprep.subr.mxu1 %v1040_v39 }
 0x633   : > { %4755 = vmatpush3.msra.mxu1 %v1040_v39 }
 0x634   : > { %4756 = vmatprep.subr.mxu1 %v1038_v40 }
 0x635   : > { %4757 = vmatpush3.msra.mxu1 %v1038_v40 }
 0x636   : > { %4759 = vmatmul.mubr.msk.f32.vlgmr.msra.gmra.mxu1 %vm1055_vm2, %v4162_v41 }
 0x637   : > { %4761 = vmatprep.mubr.msk.f32.mxu1 %vm1055_vm2, %v4163_v42 }
 0x63a   : > { %4762 = vmatmul.mubr.msk.f32.gmra.mxu1 %vm1055_vm2, %v4164_v43 }
 0x63b   : > { %4764 = vmatprep.mubr.msk.f32.mxu1 %vm1055_vm2, %v4165_v44 }
 0x63e   : > { %4765 = vmatmul.mubr.msk.f32.gmra.mxu1 %vm1055_vm2, %v4166_v45 }
 0x6f6   : > { %v5541_v46 = vpop.f32.mrf.mxu1 }
 0x6f7   : > { %1177 = vrot.lane.b32.xlu1 %v5541_v46, %s5267_s7 }
 0x6f8   : > { %v5545_v47 = vpop.f32.mrf.mxu1 }
 0x6f9   : > { %1175 = vrot.lane.b32.xlu0 %v5545_v47, %s5267_s7 }
 0x6fa   : > { %v5549_v48 = vpop.f32.mrf.mxu1 }
 0x6fb   : > { %1181 = vrot.lane.b32.xlu1 %v5549_v48, %s5267_s7 }
 0x6fc   : > { %v5553_v32 = vpop.f32.mrf.mxu1 }
 0x6fd   : > { %1179 = vrot.lane.b32.xlu0 %v5553_v32, %s5267_s7 }
 0x6fe   : > { %v5557_v49 = vpop.f32.mrf.mxu1 }
 0x6ff   : > { %1185 = vrot.lane.b32.xlu1 %v5557_v49, %s5267_s7 }
 0x700   : > { %v5561_v50 = vpop.f32.mrf.mxu1 }
 0x701   : > { %1183 = vrot.lane.b32.xlu0 %v5561_v50, %s5267_s7 }
 0x769   : > { %v1178_v59 = vpop.permute.xlu1 %1177 }
 0x76a   : > { %v1194_v60 = vsub.f32 %v5517_v33, %v1178_v59 }
 0x76b   : > { %v1176_v61 = vpop.permute.xlu0 %1175 }
 0x76c   : > { %v1193_v62 = vsub.f32 %v5509_v28, %v1176_v61  ;;  %1207 = vrot.lane.b32.xlu1 %v1194_v60, %s5266_s21 }
 0x76d   : > { %v1182_v1 = vpop.permute.xlu1 %1181 }
 0x76e   : > { %v1196_v2 = vsub.f32 %v5490_v18, %v1182_v1  ;;  %1205 = vrot.lane.b32.xlu0 %v1193_v62, %s5266_s21 }
 0x76f   : > { %v1180_v3 = vpop.permute.xlu0 %1179 }
 0x770   : > { %v1195_v4 = vsub.f32 %v5494_v22, %v1180_v3  ;;  %1211 = vrot.lane.b32.xlu1 %v1196_v2, %s5266_s21 }
 0x771   : > { %v1186_v7 = vpop.permute.xlu1 %1185 }
 0x772   : > { %v1198_v8 = vsub.f32 %v5496_v23, %v1186_v7  ;;  %1209 = vrot.lane.b32.xlu0 %v1195_v4, %s5266_s21 }
 0x773   : > { %v1184_v9 = vpop.permute.xlu0 %1183 }
 0x774   : > { %v1197_v10 = vsub.f32 %v5511_v29, %v1184_v9  ;;  %1215 = vrot.lane.b32.xlu1 %v1198_v8, %s5266_s21 }
 0x776   : > { %1213 = vrot.lane.b32.xlu0 %v1197_v10, %s5266_s21 }
 0x778   : > { %1368 = vrot.lane.b32.xlu1 %v1194_v60, %s5268_s18 }
 0x77a   : > { %1366 = vrot.lane.b32.xlu0 %v1193_v62, %s5268_s18 }
 0x77c   : > { %1372 = vrot.lane.b32.xlu1 %v1196_v2, %s5268_s18 }
 0x77e   : > { %1370 = vrot.lane.b32.xlu0 %v1195_v4, %s5268_s18 }
 0x780   : > { %1376 = vrot.lane.b32.xlu1 %v1198_v8, %s5268_s18 }
 0x782   : > { %1374 = vrot.lane.b32.xlu0 %v1197_v10, %s5268_s18 }
 0x7de   : > { %v1208_v14 = vpop.permute.xlu1 %1207 }
 0x7df   : > { %v1224_v17 = vmul.f32 %v1208_v14, %v5517_v33 }
 0x7e0   : > { %v1206_v15 = vpop.permute.xlu0 %1205 }
 0x7e1   : > { %v1223_v16 = vmul.f32 %v1206_v15, %v5509_v28  ;;  %v4213_v15 = vld [vmem:[%s6335_s2 + $0x298] sm:$0xff] }
 0x7e2   : > { %v1212_v19 = vpop.permute.xlu1 %1211  ;;  %4784 = vmatprep.subr.mxu1 %v4213_v15 }
 0x7e3   : > { %4775 = vmatprep.mubr.msk.f32.mxu0 %vm544_vm1, %v1223_v16  ;;  %v1226_v34 = vmul.f32 %v1212_v19, %v5490_v18  ;;  %v4212_v16 = vld [vmem:[%s6335_s2 + $0x290] sm:$0xff]  ;;  %4785 = vmatpush3.msra.mxu1 %v4213_v15 }
 0x7e4   : > { %4776 = vmatmul.mubr.msk.f32.vlgmr.msra.gmra.mxu0 %vm544_vm1, %v1224_v17  ;;  %v1210_v21 = vpop.permute.xlu0 %1209  ;;  %4786 = vmatprep.subr.mxu1 %v4212_v16 }
 0x7e5   : > { %v1225_v25 = vmul.f32 %v1210_v21, %v5494_v22  ;;  %4802 = vmatpush3.msra.mxu0 %v5328_v20  ;;  %4787 = vmatpush3.msra.mxu1 %v4212_v16 }
 0x7e6   : > { %4803 = vmatprep.subr.mxu0 %v5358_v52  ;;  %v1216_v36 = vpop.permute.xlu1 %1215 }
 0x7e7   : > { %4778 = vmatprep.mubr.msk.f32.mxu0 %vm544_vm1, %v1225_v25  ;;  %4804 = vmatpush3.msra.mxu0 %v5358_v52  ;;  %v1228_v22 = vmul.f32 %v1216_v36, %v5496_v23  ;;  %v4211_v36 = vld [vmem:[%s6335_s2 + $0x288] sm:$0xff] }
 0x7e8   : > { %4779 = vmatmul.mubr.msk.f32.gmra.mxu0 %vm544_vm1, %v1226_v34  ;;  %v1214_v28 = vpop.permute.xlu0 %1213  ;;  %4805 = vmatprep.subr.mxu0 %v5366_v53 }
 0x7e9   : > { %v1227_v33 = vmul.f32 %v1214_v28, %v5511_v29  ;;  %4806 = vmatpush3.msra.mxu0 %v5366_v53  ;;  %4788 = vmatprep.subr.mxu1 %v4211_v36 }
 0x7ea   : > { %4807 = vmatprep.subr.mxu0 %v5375_v54  ;;  %v1369_v60 = vpop.permute.xlu1 %1368  ;;  %4789 = vmatpush3.msra.mxu1 %v4211_v36 }
 0x7eb   : > { %4781 = vmatprep.mubr.msk.f32.mxu0 %vm544_vm1, %v1227_v33  ;;  %4808 = vmatpush3.msra.mxu0 %v5375_v54 }
 0x7ec   : > { %4782 = vmatmul.mubr.msk.f32.gmra.mxu0 %vm544_vm1, %v1228_v22  ;;  %v1367_v1 = vpop.permute.xlu0 %1366 }
 0x7ee   : > { %v1373_v14 = vpop.permute.xlu1 %1372 }
 0x7f0   : > { %v1371_v34 = vpop.permute.xlu0 %1370 }
 0x8a4   : > { %v4777_v18 = vpop.f32.mrf.mxu0 }
 0x8a5   : > { %v1343_v37 = vmul.f32 0.17677669, %v4777_v18 }
 0x8a6   : > { %v1313_v38 = vpop.f32.mrf.mxu0 }
 0x8a7   : > { %5170 = vtanh.f32 %v1343_v37  ;;  %v1342_v39 = vmul.f32 0.17677669, %v1313_v38 }
 0x8a8   : > { %v4780_v40 = vpop.f32.mrf.mxu0 }
 0x8a9   : > { %5172 = vtanh.f32 %v1342_v39  ;;  %v1345_v29 = vmul.f32 0.17677669, %v4780_v40  ;;  %v1377_v40 = vpop.permute.xlu1 %1376 }
 0x8aa   : > { %v1323_v41 = vpop.f32.mrf.mxu0 }
 0x8ab   : > { %5174 = vtanh.f32 %v1345_v29  ;;  %v1344_v42 = vmul.f32 0.17677669, %v1323_v41 }
 0x8ac   : > { %v4783_v23 = vpop.f32.mrf.mxu0 }
 0x8ad   : > { %5176 = vtanh.f32 %v1344_v42  ;;  %v1347_v43 = vmul.f32 0.17677669, %v4783_v23  ;;  %v1375_v42 = vpop.permute.xlu0 %1374 }
 0x8ae   : > { %v1333_v44 = vpop.f32.mrf.mxu0 }
 0x8af   : > { %5178 = vtanh.f32 %v1347_v43  ;;  %v1346_v45 = vmul.f32 0.17677669, %v1333_v44  ;;  %v4210_v43 = vld [vmem:[%s6335_s2 + $0x280] sm:$0xff] }
 0x8b0   : > { %4790 = vmatprep.subr.mxu1 %v4210_v43 }
 0x8b1   : > { %5180 = vtanh.f32 %v1346_v45  ;;  %4791 = vmatpush3.msra.mxu1 %v4210_v43 }
 0x8b2   : > { %4818 = vmatprep.subr.mxu1 %v5328_v20 }
 0x8b4   : > { %v5171_v59 = vpop.eup %5170 }
 0x8b5   : > { %v1355_v61 = vmul.f32 0.5, %v5171_v59 }
 0x8b6   : > { %v5173_v62 = vpop.eup %5172 }
 0x8b7   : > { %v1361_v2 = vadd.f32 0.5, %v1355_v61  ;;  %v1354_v3 = vmul.f32 0.5, %v5173_v62 }
 0x8b8   : > { %v5175_v4 = vpop.eup %5174 }
 0x8b9   : > { %v1360_v7 = vadd.f32 0.5, %v1354_v3  ;;  %v1357_v8 = vmul.f32 0.5, %v5175_v4  ;;  %v1385_v9 = vmul.f32 %v1369_v60, %v1361_v2 }
 0x8ba   : > { %v5177_v10 = vpop.eup %5176 }
 0x8bb   : > { %v1363_v17 = vadd.f32 0.5, %v1357_v8  ;;  %v1356_v19 = vmul.f32 0.5, %v5177_v10  ;;  %1398 = vrot.lane.b32.xlu1 %v1385_v9, %s5267_s7  ;;  %v1384_v21 = vmul.f32 %v1367_v1, %v1360_v7  ;;  %v1423_v9 = vrot.slane %v5486_v13, %v5346_v35 }
 0x8bc   : > { %v5179_v25 = vpop.eup %5178 }
 0x8bd   : > { %v1362_v28 = vadd.f32 0.5, %v1356_v19  ;;  %v1359_v33 = vmul.f32 0.5, %v5179_v25  ;;  %1396 = vrot.lane.b32.xlu0 %v1384_v21, %s5267_s7  ;;  %v1387_v22 = vmul.f32 %v1373_v14, %v1363_v17 }
 0x8be   : > { %v5181_v18 = vpop.eup %5180 }
 0x8bf   : > { %v1365_v37 = vadd.f32 0.5, %v1359_v33  ;;  %v1358_v38 = vmul.f32 0.5, %v5181_v18  ;;  %1402 = vrot.lane.b32.xlu1 %v1387_v22, %s5267_s7  ;;  %v1386_v39 = vmul.f32 %v1371_v34, %v1362_v28 }
 0x8c1   : > { %v1364_v29 = vadd.f32 0.5, %v1358_v38  ;;  %1400 = vrot.lane.b32.xlu0 %v1386_v39, %s5267_s7  ;;  %v1389_v41 = vmul.f32 %v1377_v40, %v1365_v37 }
 0x8c3   : > { %1406 = vrot.lane.b32.xlu1 %v1389_v41, %s5267_s7  ;;  %v1388_v23 = vmul.f32 %v1375_v42, %v1364_v29 }
 0x8c5   : > { %1404 = vrot.lane.b32.xlu0 %v1388_v23, %s5267_s7 }
 0x92d   : > { %v1399_v44 = vpop.permute.xlu1 %1398 }
 0x92e   : > { %v1415_v45 = vadd.f32 %v5541_v46, %v1399_v44 }
 0x92f   : > { %v1397_v59 = vpop.permute.xlu0 %1396 }
 0x930   : > { %v1414_v60 = vadd.f32 %v1397_v59, %v5545_v47  ;;  %1432 = vrot.lane.b32.xlu1 %v1415_v45, %s5266_s21 }
 0x931   : > { %v1403_v61 = vpop.permute.xlu1 %1402 }
 0x932   : > { %v1417_v62 = vadd.f32 %v5549_v48, %v1403_v61  ;;  %1430 = vrot.lane.b32.xlu0 %v1414_v60, %s5266_s21 }
 0x933   : > { %v1401_v1 = vpop.permute.xlu0 %1400 }
 0x934   : > { %v1416_v2 = vadd.f32 %v1401_v1, %v5553_v32  ;;  %1436 = vrot.lane.b32.xlu1 %v1417_v62, %s5266_s21 }
 0x935   : > { %v1407_v3 = vpop.permute.xlu1 %1406 }
 0x936   : > { %v1419_v4 = vadd.f32 %v5557_v49, %v1407_v3  ;;  %1434 = vrot.lane.b32.xlu0 %v1416_v2, %s5266_s21  ;;  %v4217_v2 = vld [vmem:[%s6335_s2 + $0x2d8] sm:$0xff]  ;;  %v4216_v3 = vld [vmem:[%s6335_s2 + $0x2d0] sm:$0xff] }
 0x937   : > { %v1405_v46 = vpop.permute.xlu0 %1404  ;;  %4835 = vmatprep.subr.mxu0 %v4217_v2 }
 0x938   : > { %v1418_v47 = vadd.f32 %v1405_v46, %v5561_v50  ;;  %1440 = vrot.lane.b32.xlu1 %v1419_v4, %s5266_s21  ;;  %v4215_v4 = vld [vmem:[%s6335_s2 + $0x2c8] sm:$0xff]  ;;  %v4214_v46 = vld [vmem:[%s6335_s2 + $0x2c0] sm:$0xff] }
 0x93a   : > { %1438 = vrot.lane.b32.xlu0 %v1418_v47, %s5266_s21  ;;  %v4225_v47 = vld [vmem:[%s6335_s2 + $0x338] sm:$0xff] }
 0x9a2   : > { %v1433_v48 = vpop.permute.xlu1 %1432 }
 0x9a4   : > { %v1431_v7 = vpop.permute.xlu0 %1430 }
 0x9a5   : > { %4792 = vmatprep.mubr.msk.f32.mxu1 %vm544_vm1, %v1431_v7  ;;  %v4223_v7 = vld [vmem:[%s6335_s2 + $0x328] sm:$0xff] }
 0x9a6   : > { %4793 = vmatmul.mubr.msk.f32.vlgmr.msra.gmra.mxu1 %vm544_vm1, %v1433_v48  ;;  %v1437_v32 = vpop.permute.xlu1 %1436  ;;  %v4224_v48 = vld [vmem:[%s6335_s2 + $0x330] sm:$0xff] }
 0x9a7   : > { %4819 = vmatpush3.msra.mxu1 %v5328_v20 }
 0x9a8   : > { %v1435_v8 = vpop.permute.xlu0 %1434  ;;  %4820 = vmatprep.subr.mxu1 %v5358_v52 }
 0x9a9   : > { %4795 = vmatprep.mubr.msk.f32.mxu1 %vm544_vm1, %v1435_v8  ;;  %4821 = vmatpush3.msra.mxu1 %v5358_v52 }
 0x9aa   : > { %4796 = vmatmul.mubr.msk.f32.gmra.mxu1 %vm544_vm1, %v1437_v32  ;;  %4822 = vmatprep.subr.mxu1 %v5366_v53  ;;  %v1441_v50 = vpop.permute.xlu1 %1440 }
 0x9ab   : > { %4823 = vmatpush3.msra.mxu1 %v5366_v53 }
 0x9ac   : > { %v1439_v49 = vpop.permute.xlu0 %1438  ;;  %4824 = vmatprep.subr.mxu1 %v5375_v54 }
 0x9ad   : > { %4798 = vmatprep.mubr.msk.f32.mxu1 %vm544_vm1, %v1439_v49  ;;  %4825 = vmatpush3.msra.mxu1 %v5375_v54 }
 0x9ae   : > { %4799 = vmatmul.mubr.msk.f32.gmra.mxu1 %vm544_vm1, %v1441_v50  ;;  %4852 = vmatprep.subr.mxu1 %v4225_v47 }
 0xa66   : > { %v4794_v10 = vpop.f32.mrf.mxu1 }
 0xa67   : > { %v1526_v14 = vadd.f32 %v4794_v10, %v1423_v9 }
 0xa68   : > { %v1520_v15 = vpop.f32.mrf.mxu1 }
 0xa69   : > { %v1521_v16 = vadd.f32 %v1520_v15, %v1423_v9  ;;  %v1550_v21 = vadd.f32 %v1526_v14, %v5449_v0 }
 0xa6a   : > { %v4797_v17 = vpop.f32.mrf.mxu1 }
 0xa6b   : > { %v1549_v19 = vadd.f32 %v1521_v16, %v5447_v63  ;;  %v1536_v25 = vadd.f32 %v4797_v17, %v1423_v9 }
 0xa6c   : > { %v1530_v34 = vpop.f32.mrf.mxu1 }
 0xa6d   : > { %v1531_v36 = vadd.f32 %v1530_v34, %v1423_v9  ;;  %4809 = vmatprep.mubr.msk.f32.mxu0 %vm544_vm1, %v1549_v19  ;;  %v1552_v22 = vadd.f32 %v1536_v25, %v5463_v6  ;;  %v1808_v34 = vrot.slane %v5486_v13, %v5383_v55 }
 0xa6e   : > { %v4800_v28 = vpop.f32.mrf.mxu1  ;;  %4810 = vmatmul.mubr.msk.f32.vlgmr.msra.gmra.mxu0 %vm544_vm1, %v1550_v21 }
 0xa6f   : > { %v1551_v33 = vadd.f32 %v1531_v36, %v5461_v5  ;;  %v1546_v18 = vadd.f32 %v4800_v28, %v1423_v9  ;;  %4836 = vmatpush3.msra.mxu0 %v4217_v2 }
 0xa70   : > { %v1540_v37 = vpop.f32.mrf.mxu1  ;;  %4837 = vmatprep.subr.mxu0 %v4216_v3 }
 0xa71   : > { %v1541_v38 = vadd.f32 %v1540_v37, %v1423_v9  ;;  %4812 = vmatprep.mubr.msk.f32.mxu0 %vm544_vm1, %v1551_v33  ;;  %v1554_v0 = vadd.f32 %v1546_v18, %v5477_v12  ;;  %4838 = vmatpush3.msra.mxu0 %v4216_v3  ;;  %v1818_v18 = vrot.slane %v5486_v13, %v5403_v24 }
 0xa72   : > { %4813 = vmatmul.mubr.msk.f32.gmra.mxu0 %vm544_vm1, %v1552_v22  ;;  %4839 = vmatprep.subr.mxu0 %v4215_v4 }
 0xa73   : > { %v1553_v63 = vadd.f32 %v1541_v38, %v5475_v11  ;;  %4840 = vmatpush3.msra.mxu0 %v4215_v4 }
 0xa74   : > { %4841 = vmatprep.subr.mxu0 %v4214_v46 }
 0xa75   : > { %4815 = vmatprep.mubr.msk.f32.mxu0 %vm544_vm1, %v1553_v63  ;;  %4842 = vmatpush3.msra.mxu0 %v4214_v46 }
 0xa76   : > { %4816 = vmatmul.mubr.msk.f32.gmra.mxu0 %vm544_vm1, %v1554_v0  ;;  %4877 = vmatprep.subr.mxu0 %v5328_v20  ;;  %v4222_v20 = vld [vmem:[%s6335_s2 + $0x320] sm:$0xff] }
 0xb2e   : > { %v4811_v39 = vpop.f32.mrf.mxu0 }
 0xb2f   : > { %v5689_v40 = vsub.f32 %v1550_v21, %v4811_v39 }
 0xb30   : > { %v1639_v5 = vpop.f32.mrf.mxu0 }
 0xb31   : > { %v5691_v6 = vsub.f32 %v1549_v19, %v1639_v5  ;;  %v1675_v42 = vmul.f32 %v5689_v40, %v5689_v40 }
 0xb32   : > { %v4814_v29 = vpop.f32.mrf.mxu0 }
 0xb33   : > { %v1674_v41 = vmul.f32 %v5691_v6, %v5691_v6  ;;  %v5697_v11 = vsub.f32 %v1552_v22, %v4814_v29 }
 0xb34   : > { %v1649_v12 = vpop.f32.mrf.mxu0 }
 0xb35   : > { %v5699_v23 = vsub.f32 %v1551_v33, %v1649_v12  ;;  %4826 = vmatprep.mubr.msk.f32.mxu1 %vm544_vm1, %v1674_v41  ;;  %v1677_v45 = vmul.f32 %v5697_v11, %v5697_v11 }
 0xb36   : > { %v4817_v43 = vpop.f32.mrf.mxu0  ;;  %4827 = vmatmul.mubr.msk.f32.vlgmr.msra.gmra.mxu1 %vm544_vm1, %v1675_v42 }
 0xb37   : > { %v1676_v44 = vmul.f32 %v5699_v23, %v5699_v23  ;;  %v5707_v59 = vsub.f32 %v1554_v0, %v4817_v43  ;;  %4853 = vmatpush3.msra.mxu1 %v4225_v47 }
 0xb38   : > { %v1659_v60 = vpop.f32.mrf.mxu0  ;;  %4854 = vmatprep.subr.mxu1 %v4224_v48 }
 0xb39   : > { %v5709_v61 = vsub.f32 %v1553_v63, %v1659_v60  ;;  %4829 = vmatprep.mubr.msk.f32.mxu1 %vm544_vm1, %v1676_v44  ;;  %v1679_v1 = vmul.f32 %v5707_v59, %v5707_v59  ;;  %4855 = vmatpush3.msra.mxu1 %v4224_v48 }
 0xb3a   : > { %4830 = vmatmul.mubr.msk.f32.gmra.mxu1 %vm544_vm1, %v1677_v45  ;;  %4856 = vmatprep.subr.mxu1 %v4223_v7 }
 0xb3b   : > { %v1678_v62 = vmul.f32 %v5709_v61, %v5709_v61  ;;  %4857 = vmatpush3.msra.mxu1 %v4223_v7 }
 0xb3c   : > { %4858 = vmatprep.subr.mxu1 %v4222_v20 }
 0xb3d   : > { %4832 = vmatprep.mubr.msk.f32.mxu1 %vm544_vm1, %v1678_v62  ;;  %4859 = vmatpush3.msra.mxu1 %v4222_v20  ;;  %v4219_v62 = vld [vmem:[%s6335_s2 + $0x308] sm:$0xff] }
 0xb3e   : > { %4833 = vmatmul.mubr.msk.f32.gmra.mxu1 %vm544_vm1, %v1679_v1  ;;  %v1828_v1 = vrot.slane %v5486_v13, %v5406_v27 }
 0xbf6   : > { %v4828_v32 = vpop.f32.mrf.mxu1 }
 0xbf7   : > { %v1770_v8 = vadd.f32 1e-05, %v4828_v32 }
 0xbf8   : > { %v1764_v49 = vpop.f32.mrf.mxu1 }
 0xbf9   : > { %5182 = vrsqrt.f32 %v1770_v8  ;;  %v1765_v50 = vadd.f32 1e-05, %v1764_v49 }
 0xbfa   : > { %v4831_v9 = vpop.f32.mrf.mxu1 }
 0xbfb   : > { %5184 = vrsqrt.f32 %v1765_v50  ;;  %v1780_v10 = vadd.f32 1e-05, %v4831_v9 }
 0xbfc   : > { %v1774_v14 = vpop.f32.mrf.mxu1 }
 0xbfd   : > { %5186 = vrsqrt.f32 %v1780_v10  ;;  %v1775_v15 = vadd.f32 1e-05, %v1774_v14 }
 0xbfe   : > { %v4834_v16 = vpop.f32.mrf.mxu1 }
 0xbff   : > { %5188 = vrsqrt.f32 %v1775_v15  ;;  %v1790_v17 = vadd.f32 1e-05, %v4834_v16  ;;  %v5811_v15 = vld [vmem:[%s6335_s2 + $0x190] sm:$0xff] }
 0xc00   : > { %v1784_v19 = vpop.f32.mrf.mxu1 }
 0xc01   : > { %5190 = vrsqrt.f32 %v1790_v17  ;;  %v1785_v21 = vadd.f32 1e-05, %v1784_v19  ;;  %v5820_v17 = vld [vmem:[%s6335_s2 + $0x188] sm:$0xff] }
 0xc03   : > { %5192 = vrsqrt.f32 %v1785_v21 }
 0xc06   : > { %v5183_v25 = vpop.eup %5182 }
 0xc07   : > { %v1800_v36 = vmul.f32 %v5183_v25, %v5689_v40  ;;  %v5827_v25 = vld [vmem:[%s6335_s2 + $0x180] sm:$0xff] }
 0xc08   : > { %v5185_v28 = vpop.eup %5184 }
 0xc09   : > { %v1799_v33 = vmul.f32 %v5185_v28, %v5691_v6  ;;  %v1810_v37 = vmul.f32 %v1808_v34, %v1800_v36 }
 0xc0a   : > { %v5187_v22 = vpop.eup %5186 }
 0xc0b   : > { %v1809_v38 = vmul.f32 %v1808_v34, %v1799_v33  ;;  %v1802_v63 = vmul.f32 %v5187_v22, %v5697_v11  ;;  %v5754_v41 = vadd.f32 %v1818_v18, %v1810_v37 }
 0xc0c   : > { %v5189_v0 = vpop.eup %5188 }
 0xc0d   : > { %v5751_v39 = vadd.f32 %v1818_v18, %v1809_v38  ;;  %v1801_v5 = vmul.f32 %v5189_v0, %v5699_v23  ;;  %v1812_v40 = vmul.f32 %v1808_v34, %v1802_v63  ;;  %v5767_v23 = vld [vmem:[%s6335_s2 + $0x198] sm:$0xff] }
 0xc0e   : > { %v5191_v29 = vpop.eup %5190 }
 0xc0f   : > { %4843 = vmatprep.mubr.msk.f32.mxu0 %vm544_vm1, %v5751_v39  ;;  %v1811_v6 = vmul.f32 %v1808_v34, %v1801_v5  ;;  %v1804_v42 = vmul.f32 %v5191_v29, %v5707_v59  ;;  %v5770_v44 = vadd.f32 %v1818_v18, %v1812_v40 }
 0xc10   : > { %v5193_v12 = vpop.eup %5192  ;;  %4844 = vmatmul.mubr.msk.f32.vlgmr.msra.gmra.mxu0 %vm544_vm1, %v5754_v41 }
 0xc11   : > { %v5761_v11 = vadd.f32 %v1818_v18, %v1811_v6  ;;  %v1803_v43 = vmul.f32 %v5193_v12, %v5709_v61  ;;  %4878 = vmatpush3.msra.mxu0 %v5767_v23  ;;  %v1814_v45 = vmul.f32 %v1808_v34, %v1804_v42 }
 0xc12   : > { %4879 = vmatprep.subr.mxu0 %v5358_v52 }
 0xc13   : > { %4846 = vmatprep.mubr.msk.f32.mxu0 %vm544_vm1, %v5761_v11  ;;  %v1813_v59 = vmul.f32 %v1808_v34, %v1803_v43  ;;  %4880 = vmatpush3.msra.mxu0 %v5358_v52  ;;  %v5782_v61 = vadd.f32 %v1818_v18, %v1814_v45  ;;  %v4221_v52 = vld [vmem:[%s6335_s2 + $0x318] sm:$0xff]  ;;  %v5834_v34 = vsub.s32 5, %v5333_v30 }
 0xc14   : > { %4847 = vmatmul.mubr.msk.f32.gmra.mxu0 %vm544_vm1, %v5770_v44  ;;  %4881 = vmatprep.subr.mxu0 %v5366_v53 }
 0xc15   : > { %v5779_v60 = vadd.f32 %v1818_v18, %v1813_v59  ;;  %4882 = vmatpush3.msra.mxu0 %v5366_v53  ;;  %4860 = vmatprep.subr.mxu1 %v4221_v52  ;;  %v4220_v53 = vld [vmem:[%s6335_s2 + $0x310] sm:$0xff]  ;;  %v1951_v36 = vrot.slane %v5486_v13, %v5834_v34 }
 0xc16   : > { %4883 = vmatprep.subr.mxu0 %v5375_v54  ;;  %4861 = vmatpush3.msra.mxu1 %v4221_v52 }
 0xc17   : > { %4849 = vmatprep.mubr.msk.f32.mxu0 %vm544_vm1, %v5779_v60  ;;  %4884 = vmatpush3.msra.mxu0 %v5375_v54  ;;  %v4218_v54 = vld [vmem:[%s6335_s2 + $0x300] sm:$0xff] }
 0xc18   : > { %4850 = vmatmul.mubr.msk.f32.gmra.mxu0 %vm544_vm1, %v5782_v61  ;;  %4862 = vmatprep.subr.mxu1 %v4220_v53 }
 0xc19   : > { %4863 = vmatpush3.msra.mxu1 %v4220_v53 }
 0xc1a   : > { %4864 = vmatprep.subr.mxu1 %v4219_v62 }
 0xc1b   : > { %4865 = vmatpush3.msra.mxu1 %v4219_v62 }
 0xc1c   : > { %4866 = vmatprep.subr.mxu1 %v4218_v54 }
 0xc1d   : > { %4867 = vmatpush3.msra.mxu1 %v4218_v54 }
 0xc1e   : > { %4894 = vmatprep.subr.mxu1 %v5767_v23 }
 0xcd0   : > { %v4845_v2 = vpop.f32.mrf.mxu0 }
 0xcd1   : > { %v1919_v3 = vadd.f32 %v4845_v2, %v1828_v1 }
 0xcd2   : > { %v1913_v4 = vpop.f32.mrf.mxu0 }
 0xcd3   : > { %v1914_v46 = vadd.f32 %v1913_v4, %v1828_v1  ;;  %v1943_v7 = vmax.f32 %v1919_v3, 0.0 }
 0xcd4   : > { %v4848_v47 = vpop.f32.mrf.mxu0 }
 0xcd5   : > { %v1942_v48 = vmax.f32 %v1914_v46, 0.0  ;;  %v1929_v20 = vadd.f32 %v4848_v47, %v1828_v1 }
 0xcd6   : > { %v1923_v32 = vpop.f32.mrf.mxu0 }
 0xcd7   : > { %v1924_v8 = vadd.f32 %v1923_v32, %v1828_v1  ;;  %4868 = vmatprep.mubr.msk.f32.mxu1 %vm1952_vm3, %v1942_v48  ;;  %v1945_v9 = vmax.f32 %v1929_v20, 0.0  ;;  %v4289_v32 = vld [vmem:[%s6335_s2 + $0x358] sm:$0xff] }
 0xcd8   : > { %v4851_v49 = vpop.f32.mrf.mxu0  ;;  %4869 = vmatmul.mubr.msk.f32.vlgmr.msra.gmra.mxu1 %vm1952_vm3, %v1943_v7  ;;  %4911 = vmatprep.subr.mxu0 %v4289_v32 }
 0xcd9   : > { %v1944_v50 = vmax.f32 %v1924_v8, 0.0  ;;  %4895 = vmatpush3.msra.mxu1 %v5767_v23  ;;  %v1939_v10 = vadd.f32 %v4851_v49, %v1828_v1  ;;  %v4288_v8 = vld [vmem:[%s6335_s2 + $0x350] sm:$0xff]  ;;  %v4287_v49 = vld [vmem:[%s6335_s2 + $0x348] sm:$0xff] }
 0xcda   : > { %v1933_v14 = vpop.f32.mrf.mxu0  ;;  %4896 = vmatprep.subr.mxu1 %v5811_v15 }
 0xcdb   : > { %v1934_v16 = vadd.f32 %v1933_v14, %v1828_v1  ;;  %4871 = vmatprep.mubr.msk.f32.mxu1 %vm1952_vm3, %v1944_v50  ;;  %4897 = vmatpush3.msra.mxu1 %v5811_v15  ;;  %v1947_v21 = vmax.f32 %v1939_v10, 0.0 }
 0xcdc   : > { %4872 = vmatmul.mubr.msk.f32.gmra.mxu1 %vm1952_vm3, %v1945_v9  ;;  %4898 = vmatprep.subr.mxu1 %v5820_v17 }
 0xcdd   : > { %v1946_v19 = vmax.f32 %v1934_v16, 0.0  ;;  %4899 = vmatpush3.msra.mxu1 %v5820_v17 }
 0xcde   : > { %4900 = vmatprep.subr.mxu1 %v5827_v25 }
 0xcdf   : > { %4874 = vmatprep.mubr.msk.f32.mxu1 %vm1952_vm3, %v1946_v19  ;;  %4901 = vmatpush3.msra.mxu1 %v5827_v25 }
 0xce0   : > { %4875 = vmatmul.mubr.msk.f32.gmra.mxu1 %vm1952_vm3, %v1947_v21 }
 0xd98   : > { %v4870_v28 = vpop.f32.mrf.mxu1 }
 0xd99   : > { %v2043_v33 = vadd.f32 %v4870_v28, %v1951_v36 }
 0xd9a   : > { %v2037_v22 = vpop.f32.mrf.mxu1 }
 0xd9b   : > { %v2038_v18 = vadd.f32 %v2037_v22, %v1951_v36  ;;  %v2067_v63 = vadd.f32 %v2043_v33, %v5754_v41 }
 0xd9c   : > { %v4873_v37 = vpop.f32.mrf.mxu1 }
 0xd9d   : > { %v2066_v38 = vadd.f32 %v2038_v18, %v5751_v39  ;;  %v2053_v0 = vadd.f32 %v4873_v37, %v1951_v36  ;;  %v5876_v37 = vsub.s32 6, %v5333_v30 }
 0xd9e   : > { %v2047_v5 = vpop.f32.mrf.mxu1 }
 0xd9f   : > { %v2048_v29 = vadd.f32 %v2047_v5, %v1951_v36  ;;  %4885 = vmatprep.mubr.msk.f32.mxu0 %vm544_vm1, %v2066_v38  ;;  %v2069_v42 = vadd.f32 %v2053_v0, %v5770_v44  ;;  %v5881_v0 = vsub.s32 7, %v5333_v30 }
 0xda0   : > { %v4876_v40 = vpop.f32.mrf.mxu1  ;;  %4886 = vmatmul.mubr.msk.f32.vlgmr.msra.gmra.mxu0 %vm544_vm1, %v2067_v63 }
 0xda1   : > { %v2068_v6 = vadd.f32 %v2048_v29, %v5761_v11  ;;  %v2063_v12 = vadd.f32 %v4876_v40, %v1951_v36  ;;  %4912 = vmatpush3.msra.mxu0 %v4289_v32 }
 0xda2   : > { %v2057_v43 = vpop.f32.mrf.mxu1  ;;  %4913 = vmatprep.subr.mxu0 %v4288_v8 }
 0xda3   : > { %v2058_v45 = vadd.f32 %v2057_v43, %v1951_v36  ;;  %4888 = vmatprep.mubr.msk.f32.mxu0 %vm544_vm1, %v2068_v6  ;;  %v2071_v41 = vadd.f32 %v2063_v12, %v5782_v61  ;;  %4914 = vmatpush3.msra.mxu0 %v4288_v8  ;;  %v2335_v12 = vrot.slane %v5486_v13, %v5881_v0 }
 0xda4   : > { %4889 = vmatmul.mubr.msk.f32.gmra.mxu0 %vm544_vm1, %v2069_v42  ;;  %4915 = vmatprep.subr.mxu0 %v4287_v49 }
 0xda5   : > { %v2070_v39 = vadd.f32 %v2058_v45, %v5779_v60  ;;  %4916 = vmatpush3.msra.mxu0 %v4287_v49 }
 0xda7   : > { %4891 = vmatprep.mubr.msk.f32.mxu0 %vm544_vm1, %v2070_v39 }
 0xda8   : > { %4892 = vmatmul.mubr.msk.f32.gmra.mxu0 %vm544_vm1, %v2071_v41 }
 0xe60   : > { %v4887_v59 = vpop.f32.mrf.mxu0 }
 0xe61   : > { %v2186_v52 = vsub.f32 %v2067_v63, %v4887_v59  ;;  %v2325_v63 = vrot.slane %v5486_v13, %v5876_v37 }
 0xe62   : > { %v2156_v11 = vpop.f32.mrf.mxu0 }
 0xe63   : > { %v2185_v53 = vsub.f32 %v2066_v38, %v2156_v11  ;;  %v2192_v54 = vmul.f32 %v2186_v52, %v2186_v52 }
 0xe64   : > { %v4890_v44 = vpop.f32.mrf.mxu0 }
 0xe65   : > { %v2191_v62 = vmul.f32 %v2185_v53, %v2185_v53  ;;  %v2188_v1 = vsub.f32 %v2069_v42, %v4890_v44 }
 0xe66   : > { %v2166_v2 = vpop.f32.mrf.mxu0 }
 0xe67   : > { %v2187_v3 = vsub.f32 %v2068_v6, %v2166_v2  ;;  %4902 = vmatprep.mubr.msk.f32.mxu1 %vm544_vm1, %v2191_v62  ;;  %v2194_v61 = vmul.f32 %v2188_v1, %v2188_v1 }
 0xe68   : > { %v4893_v4 = vpop.f32.mrf.mxu0  ;;  %4903 = vmatmul.mubr.msk.f32.vlgmr.msra.gmra.mxu1 %vm544_vm1, %v2192_v54 }
 0xe69   : > { %v2193_v60 = vmul.f32 %v2187_v3, %v2187_v3  ;;  %v2190_v46 = vsub.f32 %v2071_v41, %v4893_v4 }
 0xe6a   : > { %v2176_v47 = vpop.f32.mrf.mxu0 }
 0xe6b   : > { %v5852_v48 = vsub.f32 %v2070_v39, %v2176_v47  ;;  %4905 = vmatprep.mubr.msk.f32.mxu1 %vm544_vm1, %v2193_v60  ;;  %v2196_v20 = vmul.f32 %v2190_v46, %v2190_v46 }
 0xe6c   : > { %4906 = vmatmul.mubr.msk.f32.gmra.mxu1 %vm544_vm1, %v2194_v61 }
 0xe6d   : > { %v2195_v7 = vmul.f32 %v5852_v48, %v5852_v48 }
 0xe6f   : > { %4908 = vmatprep.mubr.msk.f32.mxu1 %vm544_vm1, %v2195_v7 }
 0xe70   : > { %4909 = vmatmul.mubr.msk.f32.gmra.mxu1 %vm544_vm1, %v2196_v20 }
 0xe71   : > { %4940 = vmatprep.mubr.msk.f32.mxu1 %vm1055_vm2, %v5501_v26  ;;  %v4286_v26 = vld [vmem:[%s6335_s2 + $0x340] sm:$0xff] }
 0xe72   : > { %4917 = vmatprep.subr.mxu0 %v4286_v26 }
 0xe73   : > { %4918 = vmatpush3.msra.mxu0 %v4286_v26 }
 0xe74   : > { %4949 = vmatprep.subr.mxu0 %v5568_v51 }
 0xf28   : > { %v4904_v50 = vpop.f32.mrf.mxu1 }
 0xf29   : > { %v2287_v9 = vadd.f32 1e-05, %v4904_v50 }
 0xf2a   : > { %v2281_v10 = vpop.f32.mrf.mxu1 }
 0xf2b   : > { %5194 = vrsqrt.f32 %v2287_v9  ;;  %v2282_v14 = vadd.f32 1e-05, %v2281_v10 }
 0xf2c   : > { %v4907_v16 = vpop.f32.mrf.mxu1 }
 0xf2d   : > { %5196 = vrsqrt.f32 %v2282_v14  ;;  %v2297_v19 = vadd.f32 1e-05, %v4907_v16 }
 0xf2e   : > { %v2291_v21 = vpop.f32.mrf.mxu1 }
 0xf2f   : > { %5198 = vrsqrt.f32 %v2297_v19  ;;  %v2292_v36 = vadd.f32 1e-05, %v2291_v21  ;;  %v5248_v19 = vld [vmem:[%s6335_s2 + $0xc8] sm:$0xff]  ;;  %v5249_v21 = vld [vmem:[%s6335_s2 + $0xd0] sm:$0xff] }
 0xf30   : > { %v4910_v28 = vpop.f32.mrf.mxu1 }
 0xf31   : > { %5200 = vrsqrt.f32 %v2292_v36  ;;  %v2307_v33 = vadd.f32 1e-05, %v4910_v28  ;;  %v5250_v36 = vld [vmem:[%s6335_s2 + $0xd8] sm:$0xff]  ;;  %v5251_v28 = vld [vmem:[%s6335_s2 + $0xe0] sm:$0xff] }
 0xf32   : > { %v2301_v22 = vpop.f32.mrf.mxu1 }
 0xf33   : > { %5202 = vrsqrt.f32 %v2307_v33  ;;  %v2302_v18 = vadd.f32 1e-05, %v2301_v22  ;;  %v5252_v33 = vld [vmem:[%s6335_s2 + $0xe8] sm:$0xff] }
 0xf35   : > { %5204 = vrsqrt.f32 %v2302_v18 }
 0xf38   : > { %v5195_v38 = vpop.eup %5194 }
 0xf39   : > { %v2317_v5 = vmul.f32 %v5195_v38, %v2186_v52 }
 0xf3a   : > { %v5197_v29 = vpop.eup %5196 }
 0xf3b   : > { %v2316_v40 = vmul.f32 %v5197_v29, %v2185_v53  ;;  %v2327_v42 = vmul.f32 %v2325_v63, %v2317_v5 }
 0xf3c   : > { %v5199_v6 = vpop.eup %5198 }
 0xf3d   : > { %v2326_v43 = vmul.f32 %v2325_v63, %v2316_v40  ;;  %v2319_v45 = vmul.f32 %v5199_v6, %v2188_v1  ;;  %v5887_v44 = vadd.f32 %v2335_v12, %v2327_v42 }
 0xf3e   : > { %v5201_v39 = vpop.eup %5200 }
 0xf3f   : > { %v5885_v41 = vadd.f32 %v2335_v12, %v2326_v43  ;;  %v2318_v59 = vmul.f32 %v5201_v39, %v2187_v3  ;;  %v2329_v62 = vmul.f32 %v2325_v63, %v2319_v45 }
 0xf40   : > { %v5203_v11 = vpop.eup %5202 }
 0xf41   : > { %4919 = vmatprep.mubr.msk.f32.mxu0 %vm544_vm1, %v5885_v41  ;;  %v2328_v30 = vmul.f32 %v2325_v63, %v2318_v59  ;;  %v2321_v52 = vmul.f32 %v5203_v11, %v2190_v46  ;;  %v5897_v1 = vadd.f32 %v2335_v12, %v2329_v62 }
 0xf42   : > { %v5205_v53 = vpop.eup %5204  ;;  %4920 = vmatmul.mubr.msk.f32.vlgmr.msra.gmra.mxu0 %vm544_vm1, %v5887_v44 }
 0xf43   : > { %v5893_v13 = vadd.f32 %v2335_v12, %v2328_v30  ;;  %v2320_v54 = vmul.f32 %v5205_v53, %v5852_v48  ;;  %4950 = vmatpush3.msra.mxu0 %v5568_v51  ;;  %v2331_v2 = vmul.f32 %v2325_v63, %v2321_v52 }
 0xf44   : > { %4951 = vmatprep.subr.mxu0 %v5573_v56 }
 0xf45   : > { %4922 = vmatprep.mubr.msk.f32.mxu0 %vm544_vm1, %v5893_v13  ;;  %v2330_v3 = vmul.f32 %v2325_v63, %v2320_v54  ;;  %4952 = vmatpush3.msra.mxu0 %v5573_v56  ;;  %v5909_v51 = vadd.f32 %v2335_v12, %v2331_v2 }
 0xf46   : > { %4923 = vmatmul.mubr.msk.f32.gmra.mxu0 %vm544_vm1, %v5897_v1  ;;  %4953 = vmatprep.subr.mxu0 %v5580_v57 }
 0xf47   : > { %v5906_v4 = vadd.f32 %v2335_v12, %v2330_v3  ;;  %4954 = vmatpush3.msra.mxu0 %v5580_v57  ;;  %v5921_v57 = vld [vmem:[%s6334_s1 + $0x10] sm:$0xff] }
 0xf48   : > { %4955 = vmatprep.subr.mxu0 %v5589_v58  ;;  %v2369_v47 = vrot.slane %v5921_v57, %v5336_v31 }
 0xf49   : > { %4925 = vmatprep.mubr.msk.f32.mxu0 %vm544_vm1, %v5906_v4  ;;  %4956 = vmatpush3.msra.mxu0 %v5589_v58 }
 0xf4a   : > { %4926 = vmatmul.mubr.msk.f32.gmra.mxu0 %vm544_vm1, %v5909_v51  ;;  %4983 = vmatprep.subr.mxu0 %v5767_v23 }
0x1002   : > { %v4921_v56 = vpop.f32.mrf.mxu0 }
0x1003   : > { %v5939_v31 = vadd.f32 %v4921_v56, %v2369_v47 }
0x1004   : > { %v2454_v60 = vpop.f32.mrf.mxu0 }
0x1005   : > { %v5943_v49 = vadd.f32 %v2454_v60, %v2369_v47 }
0x1006   : > { %v4924_v61 = vpop.f32.mrf.mxu0 }
0x1007   : > { %v5931_v32 = vadd.f32 %v4924_v61, %v2369_v47 }
0x1008   : > { %v2464_v46 = vpop.f32.mrf.mxu0 }
0x1009   : > { %v5935_v8 = vadd.f32 %v2464_v46, %v2369_v47 }
0x100a   : > { %v4927_v48 = vpop.f32.mrf.mxu0 }
0x100b   : > { %v5925_v7 = vadd.f32 %v4927_v48, %v2369_v47 }
0x100c   : > { %v2474_v58 = vpop.f32.mrf.mxu0 }
0x100d   : > { %v5927_v20 = vadd.f32 %v2474_v58, %v2369_v47  ;;  %2499 = vrot.lane.b32.xlu0 %v5925_v7, %s5266_s21 }
0x100f   : > { %2497 = vrot.lane.b32.xlu1 %v5927_v20, %s5266_s21 }
0x1011   : > { %2495 = vrot.lane.b32.xlu0 %v5931_v32, %s5266_s21 }
0x1013   : > { %2493 = vrot.lane.b32.xlu1 %v5935_v8, %s5266_s21 }
0x1015   : > { %2491 = vrot.lane.b32.xlu0 %v5939_v31, %s5266_s21 }
0x1017   : > { %2489 = vrot.lane.b32.xlu1 %v5943_v49, %s5266_s21 }
0x107f   : > { %v2500_v26 = vpop.permute.xlu0 %2499 }
0x1080   : > { %4928 = vmatprep.subr.mxu1 %v2500_v26 }
0x1081   : > { %4929 = vmatpush3.msra.mxu1 %v2500_v26  ;;  %v2498_v50 = vpop.permute.xlu1 %2497 }
0x1082   : > { %4930 = vmatprep.subr.mxu1 %v2498_v50 }
0x1083   : > { %v2496_v9 = vpop.permute.xlu0 %2495  ;;  %4931 = vmatpush3.msra.mxu1 %v2498_v50 }
0x1084   : > { %4932 = vmatprep.subr.mxu1 %v2496_v9 }
0x1085   : > { %4933 = vmatpush3.msra.mxu1 %v2496_v9  ;;  %v2494_v10 = vpop.permute.xlu1 %2493 }
0x1086   : > { %4934 = vmatprep.subr.mxu1 %v2494_v10 }
0x1087   : > { %v2492_v14 = vpop.permute.xlu0 %2491  ;;  %4935 = vmatpush3.msra.mxu1 %v2494_v10 }
0x1088   : > { %4936 = vmatprep.subr.mxu1 %v2492_v14 }
0x1089   : > { %4937 = vmatpush3.msra.mxu1 %v2492_v14  ;;  %v2490_v16 = vpop.permute.xlu1 %2489 }
0x108a   : > { %4938 = vmatprep.subr.mxu1 %v2490_v16 }
0x108b   : > { %4939 = vmatpush3.msra.mxu1 %v2490_v16 }
0x108c   : > { %4941 = vmatmul.mubr.msk.f32.vlgmr.msra.gmra.mxu1 %vm1055_vm2, %v5248_v19 }
0x108d   : > { %4943 = vmatprep.mubr.msk.f32.mxu1 %vm1055_vm2, %v5249_v21 }
0x1090   : > { %4944 = vmatmul.mubr.msk.f32.gmra.mxu1 %vm1055_vm2, %v5250_v36 }
0x1091   : > { %4946 = vmatprep.mubr.msk.f32.mxu1 %vm1055_vm2, %v5251_v28 }
0x1094   : > { %4947 = vmatmul.mubr.msk.f32.gmra.mxu1 %vm1055_vm2, %v5252_v33 }
0x114c   : > { %v5969_v22 = vpop.f32.mrf.mxu1 }
0x114d   : > { %2610 = vrot.lane.b32.xlu1 %v5969_v22, %s5267_s7 }
0x114e   : > { %v5973_v18 = vpop.f32.mrf.mxu1 }
0x114f   : > { %2608 = vrot.lane.b32.xlu0 %v5973_v18, %s5267_s7 }
0x1150   : > { %v5977_v38 = vpop.f32.mrf.mxu1 }
0x1151   : > { %2614 = vrot.lane.b32.xlu1 %v5977_v38, %s5267_s7 }
0x1152   : > { %v5981_v63 = vpop.f32.mrf.mxu1 }
0x1153   : > { %2612 = vrot.lane.b32.xlu0 %v5981_v63, %s5267_s7 }
0x1154   : > { %v5985_v5 = vpop.f32.mrf.mxu1 }
0x1155   : > { %2618 = vrot.lane.b32.xlu1 %v5985_v5, %s5267_s7 }
0x1156   : > { %v5989_v29 = vpop.f32.mrf.mxu1 }
0x1157   : > { %2616 = vrot.lane.b32.xlu0 %v5989_v29, %s5267_s7 }
0x11bf   : > { %v2611_v40 = vpop.permute.xlu1 %2610 }
0x11c0   : > { %v2627_v6 = vsub.f32 %v5939_v31, %v2611_v40 }
0x11c1   : > { %v2609_v42 = vpop.permute.xlu0 %2608 }
0x11c2   : > { %v2626_v12 = vsub.f32 %v5943_v49, %v2609_v42  ;;  %2640 = vrot.lane.b32.xlu1 %v2627_v6, %s5266_s21 }
0x11c3   : > { %v2615_v43 = vpop.permute.xlu1 %2614 }
0x11c4   : > { %v2629_v45 = vsub.f32 %v5931_v32, %v2615_v43  ;;  %2638 = vrot.lane.b32.xlu0 %v2626_v12, %s5266_s21 }
0x11c5   : > { %v2613_v39 = vpop.permute.xlu0 %2612 }
0x11c6   : > { %v2628_v59 = vsub.f32 %v5935_v8, %v2613_v39  ;;  %2644 = vrot.lane.b32.xlu1 %v2629_v45, %s5266_s21 }
0x11c7   : > { %v2619_v11 = vpop.permute.xlu1 %2618 }
0x11c8   : > { %v2631_v62 = vsub.f32 %v5925_v7, %v2619_v11  ;;  %2642 = vrot.lane.b32.xlu0 %v2628_v59, %s5266_s21 }
0x11c9   : > { %v2617_v30 = vpop.permute.xlu0 %2616 }
0x11ca   : > { %v2630_v52 = vsub.f32 %v5927_v20, %v2617_v30  ;;  %2648 = vrot.lane.b32.xlu1 %v2631_v62, %s5266_s21  ;;  %v4292_v30 = vld [vmem:[%s6335_s2 + $0x390] sm:$0xff] }
0x11cc   : > { %2646 = vrot.lane.b32.xlu0 %v2630_v52, %s5266_s21 }
0x11ce   : > { %2801 = vrot.lane.b32.xlu1 %v2627_v6, %s5268_s18 }
0x11d0   : > { %2799 = vrot.lane.b32.xlu0 %v2626_v12, %s5268_s18 }
0x11d2   : > { %2805 = vrot.lane.b32.xlu1 %v2629_v45, %s5268_s18 }
0x11d4   : > { %2803 = vrot.lane.b32.xlu0 %v2628_v59, %s5268_s18 }
0x11d6   : > { %2809 = vrot.lane.b32.xlu1 %v2631_v62, %s5268_s18  ;;  %v4293_v62 = vld [vmem:[%s6335_s2 + $0x398] sm:$0xff] }
0x11d7   : > { %4966 = vmatprep.subr.mxu1 %v4293_v62 }
0x11d8   : > { %2807 = vrot.lane.b32.xlu0 %v2630_v52, %s5268_s18  ;;  %4967 = vmatpush3.msra.mxu1 %v4293_v62 }
0x11d9   : > { %4968 = vmatprep.subr.mxu1 %v4292_v30 }
0x11da   : > { %4969 = vmatpush3.msra.mxu1 %v4292_v30 }
0x1234   : > { %v2641_v53 = vpop.permute.xlu1 %2640 }
0x1235   : > { %v2657_v3 = vmul.f32 %v2641_v53, %v5939_v31 }
0x1236   : > { %v2639_v54 = vpop.permute.xlu0 %2638 }
0x1237   : > { %v2656_v2 = vmul.f32 %v2639_v54, %v5943_v49 }
0x1238   : > { %v2645_v56 = vpop.permute.xlu1 %2644 }
0x1239   : > { %4957 = vmatprep.mubr.msk.f32.mxu0 %vm544_vm1, %v2656_v2  ;;  %v2659_v46 = vmul.f32 %v2645_v56, %v5931_v32  ;;  %v4291_v56 = vld [vmem:[%s6335_s2 + $0x388] sm:$0xff] }
0x123a   : > { %4958 = vmatmul.mubr.msk.f32.vlgmr.msra.gmra.mxu0 %vm544_vm1, %v2657_v3  ;;  %v2643_v60 = vpop.permute.xlu0 %2642  ;;  %4970 = vmatprep.subr.mxu1 %v4291_v56 }
0x123b   : > { %v2658_v61 = vmul.f32 %v2643_v60, %v5935_v8  ;;  %4984 = vmatpush3.msra.mxu0 %v5767_v23  ;;  %4971 = vmatpush3.msra.mxu1 %v4291_v56 }
0x123c   : > { %4985 = vmatprep.subr.mxu0 %v5811_v15  ;;  %v2649_v47 = vpop.permute.xlu1 %2648 }
0x123d   : > { %4960 = vmatprep.mubr.msk.f32.mxu0 %vm544_vm1, %v2658_v61  ;;  %4986 = vmatpush3.msra.mxu0 %v5811_v15  ;;  %v2661_v8 = vmul.f32 %v2649_v47, %v5925_v7 }
0x123e   : > { %4961 = vmatmul.mubr.msk.f32.gmra.mxu0 %vm544_vm1, %v2659_v46  ;;  %v2647_v48 = vpop.permute.xlu0 %2646  ;;  %4987 = vmatprep.subr.mxu0 %v5820_v17 }
0x123f   : > { %v2660_v58 = vmul.f32 %v2647_v48, %v5927_v20  ;;  %4988 = vmatpush3.msra.mxu0 %v5820_v17 }
0x1240   : > { %4989 = vmatprep.subr.mxu0 %v5827_v25  ;;  %v2802_v36 = vpop.permute.xlu1 %2801 }
0x1241   : > { %4963 = vmatprep.mubr.msk.f32.mxu0 %vm544_vm1, %v2660_v58  ;;  %4990 = vmatpush3.msra.mxu0 %v5827_v25 }
0x1242   : > { %4964 = vmatmul.mubr.msk.f32.gmra.mxu0 %vm544_vm1, %v2661_v8  ;;  %v2800_v40 = vpop.permute.xlu0 %2799 }
0x1244   : > { %v2806_v11 = vpop.permute.xlu1 %2805 }
0x1246   : > { %v2804_v3 = vpop.permute.xlu0 %2803 }
0x12fa   : > { %v4959_v32 = vpop.f32.mrf.mxu0 }
0x12fb   : > { %v2776_v31 = vmul.f32 0.17677669, %v4959_v32  ;;  %v2810_v32 = vpop.permute.xlu1 %2809 }
0x12fc   : > { %v2746_v49 = vpop.f32.mrf.mxu0 }
0x12fd   : > { %5206 = vtanh.f32 %v2776_v31  ;;  %v2775_v26 = vmul.f32 0.17677669, %v2746_v49 }
0x12fe   : > { %v4962_v50 = vpop.f32.mrf.mxu0 }
0x12ff   : > { %5208 = vtanh.f32 %v2775_v26  ;;  %v2778_v20 = vmul.f32 0.17677669, %v4962_v50  ;;  %v2808_v26 = vpop.permute.xlu0 %2807 }
0x1300   : > { %v2756_v9 = vpop.f32.mrf.mxu0 }
0x1301   : > { %5210 = vtanh.f32 %v2778_v20  ;;  %v2777_v10 = vmul.f32 0.17677669, %v2756_v9  ;;  %v4290_v20 = vld [vmem:[%s6335_s2 + $0x380] sm:$0xff] }
0x1302   : > { %v4965_v7 = vpop.f32.mrf.mxu0  ;;  %4972 = vmatprep.subr.mxu1 %v4290_v20 }
0x1303   : > { %5212 = vtanh.f32 %v2777_v10  ;;  %v2780_v14 = vmul.f32 0.17677669, %v4965_v7  ;;  %4973 = vmatpush3.msra.mxu1 %v4290_v20 }
0x1304   : > { %v2766_v16 = vpop.f32.mrf.mxu0  ;;  %5000 = vmatprep.subr.mxu1 %v5767_v23 }
0x1305   : > { %5214 = vtanh.f32 %v2780_v14  ;;  %v2779_v19 = vmul.f32 0.17677669, %v2766_v16 }
0x1307   : > { %5216 = vtanh.f32 %v2779_v19 }
0x130a   : > { %v5207_v21 = vpop.eup %5206 }
0x130b   : > { %v2788_v28 = vmul.f32 0.5, %v5207_v21 }
0x130c   : > { %v5209_v33 = vpop.eup %5208 }
0x130d   : > { %v2794_v6 = vadd.f32 0.5, %v2788_v28  ;;  %v2787_v42 = vmul.f32 0.5, %v5209_v33 }
0x130e   : > { %v5211_v12 = vpop.eup %5210 }
0x130f   : > { %v2793_v43 = vadd.f32 0.5, %v2787_v42  ;;  %v2790_v45 = vmul.f32 0.5, %v5211_v12  ;;  %v2818_v39 = vmul.f32 %v2802_v36, %v2794_v6  ;;  %v2856_v42 = vrot.slane %v5921_v57, %v5346_v35 }
0x1310   : > { %v5213_v59 = vpop.eup %5212 }
0x1311   : > { %v2796_v52 = vadd.f32 0.5, %v2790_v45  ;;  %v2789_v53 = vmul.f32 0.5, %v5213_v59  ;;  %2831 = vrot.lane.b32.xlu1 %v2818_v39, %s5267_s7  ;;  %v2817_v54 = vmul.f32 %v2800_v40, %v2793_v43 }
0x1312   : > { %v5215_v2 = vpop.eup %5214 }
0x1313   : > { %v2795_v60 = vadd.f32 0.5, %v2789_v53  ;;  %v2792_v61 = vmul.f32 0.5, %v5215_v2  ;;  %2829 = vrot.lane.b32.xlu0 %v2817_v54, %s5267_s7  ;;  %v2820_v46 = vmul.f32 %v2806_v11, %v2796_v52 }
0x1314   : > { %v5217_v47 = vpop.eup %5216 }
0x1315   : > { %v2798_v48 = vadd.f32 0.5, %v2792_v61  ;;  %v2791_v58 = vmul.f32 0.5, %v5217_v47  ;;  %2835 = vrot.lane.b32.xlu1 %v2820_v46, %s5267_s7  ;;  %v2819_v8 = vmul.f32 %v2804_v3, %v2795_v60 }
0x1317   : > { %v2797_v31 = vadd.f32 0.5, %v2791_v58  ;;  %2833 = vrot.lane.b32.xlu0 %v2819_v8, %s5267_s7  ;;  %v2822_v49 = vmul.f32 %v2810_v32, %v2798_v48 }
0x1319   : > { %2839 = vrot.lane.b32.xlu1 %v2822_v49, %s5267_s7  ;;  %v2821_v50 = vmul.f32 %v2808_v26, %v2797_v31 }
0x131b   : > { %2837 = vrot.lane.b32.xlu0 %v2821_v50, %s5267_s7 }
0x1383   : > { %v2832_v9 = vpop.permute.xlu1 %2831 }
0x1384   : > { %v2848_v10 = vadd.f32 %v5969_v22, %v2832_v9 }
0x1385   : > { %v2830_v7 = vpop.permute.xlu0 %2829 }
0x1386   : > { %v2847_v14 = vadd.f32 %v2830_v7, %v5973_v18  ;;  %2865 = vrot.lane.b32.xlu1 %v2848_v10, %s5266_s21  ;;  %v4297_v7 = vld [vmem:[%s6335_s2 + $0x3d8] sm:$0xff] }
0x1387   : > { %v2836_v16 = vpop.permute.xlu1 %2835  ;;  %5017 = vmatprep.subr.mxu0 %v4297_v7 }
0x1388   : > { %v2850_v19 = vadd.f32 %v5977_v38, %v2836_v16  ;;  %2863 = vrot.lane.b32.xlu0 %v2847_v14, %s5266_s21  ;;  %v4296_v14 = vld [vmem:[%s6335_s2 + $0x3d0] sm:$0xff]  ;;  %v4295_v16 = vld [vmem:[%s6335_s2 + $0x3c8] sm:$0xff] }
0x1389   : > { %v2834_v21 = vpop.permute.xlu0 %2833 }
0x138a   : > { %v2849_v36 = vadd.f32 %v2834_v21, %v5981_v63  ;;  %2869 = vrot.lane.b32.xlu1 %v2850_v19, %s5266_s21  ;;  %v4294_v19 = vld [vmem:[%s6335_s2 + $0x3c0] sm:$0xff]  ;;  %v4305_v21 = vld [vmem:[%s6335_s2 + $0x438] sm:$0xff] }
0x138b   : > { %v2840_v28 = vpop.permute.xlu1 %2839 }
0x138c   : > { %v2852_v33 = vadd.f32 %v5985_v5, %v2840_v28  ;;  %2867 = vrot.lane.b32.xlu0 %v2849_v36, %s5266_s21  ;;  %v4304_v36 = vld [vmem:[%s6335_s2 + $0x430] sm:$0xff]  ;;  %v4303_v28 = vld [vmem:[%s6335_s2 + $0x428] sm:$0xff] }
0x138d   : > { %v2838_v22 = vpop.permute.xlu0 %2837 }
0x138e   : > { %v2851_v18 = vadd.f32 %v2838_v22, %v5989_v29  ;;  %2873 = vrot.lane.b32.xlu1 %v2852_v33, %s5266_s21  ;;  %v4302_v33 = vld [vmem:[%s6335_s2 + $0x420] sm:$0xff] }
0x1390   : > { %2871 = vrot.lane.b32.xlu0 %v2851_v18, %s5266_s21 }
0x13f8   : > { %v2866_v38 = vpop.permute.xlu1 %2865 }
0x13fa   : > { %v2864_v40 = vpop.permute.xlu0 %2863 }
0x13fb   : > { %4974 = vmatprep.mubr.msk.f32.mxu1 %vm544_vm1, %v2864_v40 }
0x13fc   : > { %4975 = vmatmul.mubr.msk.f32.vlgmr.msra.gmra.mxu1 %vm544_vm1, %v2866_v38  ;;  %v2870_v63 = vpop.permute.xlu1 %2869 }
0x13fd   : > { %5001 = vmatpush3.msra.mxu1 %v5767_v23 }
0x13fe   : > { %v2868_v6 = vpop.permute.xlu0 %2867  ;;  %5002 = vmatprep.subr.mxu1 %v5811_v15 }
0x13ff   : > { %4977 = vmatprep.mubr.msk.f32.mxu1 %vm544_vm1, %v2868_v6  ;;  %5003 = vmatpush3.msra.mxu1 %v5811_v15 }
0x1400   : > { %4978 = vmatmul.mubr.msk.f32.gmra.mxu1 %vm544_vm1, %v2870_v63  ;;  %5004 = vmatprep.subr.mxu1 %v5820_v17  ;;  %v2874_v29 = vpop.permute.xlu1 %2873 }
0x1401   : > { %5005 = vmatpush3.msra.mxu1 %v5820_v17 }
0x1402   : > { %v2872_v5 = vpop.permute.xlu0 %2871  ;;  %5006 = vmatprep.subr.mxu1 %v5827_v25 }
0x1403   : > { %4980 = vmatprep.mubr.msk.f32.mxu1 %vm544_vm1, %v2872_v5  ;;  %5007 = vmatpush3.msra.mxu1 %v5827_v25 }
0x1404   : > { %4981 = vmatmul.mubr.msk.f32.gmra.mxu1 %vm544_vm1, %v2874_v29  ;;  %5034 = vmatprep.subr.mxu1 %v4305_v21 }
0x14bc   : > { %v4976_v12 = vpop.f32.mrf.mxu1 }
0x14bd   : > { %v2959_v43 = vadd.f32 %v4976_v12, %v2856_v42 }
0x14be   : > { %v2953_v45 = vpop.f32.mrf.mxu1 }
0x14bf   : > { %v2954_v39 = vadd.f32 %v2953_v45, %v2856_v42  ;;  %v2983_v62 = vadd.f32 %v2959_v43, %v5887_v44 }
0x14c0   : > { %v4979_v59 = vpop.f32.mrf.mxu1 }
0x14c1   : > { %v2982_v11 = vadd.f32 %v2954_v39, %v5885_v41  ;;  %v2969_v30 = vadd.f32 %v4979_v59, %v2856_v42  ;;  %v3241_v59 = vrot.slane %v5921_v57, %v5383_v55 }
0x14c2   : > { %v2963_v52 = vpop.f32.mrf.mxu1 }
0x14c3   : > { %v2964_v53 = vadd.f32 %v2963_v52, %v2856_v42  ;;  %4991 = vmatprep.mubr.msk.f32.mxu0 %vm544_vm1, %v2982_v11  ;;  %v2985_v35 = vadd.f32 %v2969_v30, %v5897_v1 }
0x14c4   : > { %v4982_v54 = vpop.f32.mrf.mxu1  ;;  %4992 = vmatmul.mubr.msk.f32.vlgmr.msra.gmra.mxu0 %vm544_vm1, %v2983_v62 }
0x14c5   : > { %v2984_v2 = vadd.f32 %v2964_v53, %v5893_v13  ;;  %v2979_v3 = vadd.f32 %v4982_v54, %v2856_v42  ;;  %5018 = vmatpush3.msra.mxu0 %v4297_v7  ;;  %v3251_v53 = vrot.slane %v5921_v57, %v5403_v24 }
0x14c6   : > { %v2973_v56 = vpop.f32.mrf.mxu1  ;;  %5019 = vmatprep.subr.mxu0 %v4296_v14 }
0x14c7   : > { %v2974_v60 = vadd.f32 %v2973_v56, %v2856_v42  ;;  %4994 = vmatprep.mubr.msk.f32.mxu0 %vm544_vm1, %v2984_v2  ;;  %v2987_v44 = vadd.f32 %v2979_v3, %v5909_v51  ;;  %5020 = vmatpush3.msra.mxu0 %v4296_v14 }
0x14c8   : > { %4995 = vmatmul.mubr.msk.f32.gmra.mxu0 %vm544_vm1, %v2985_v35  ;;  %5021 = vmatprep.subr.mxu0 %v4295_v16 }
0x14c9   : > { %v2986_v41 = vadd.f32 %v2974_v60, %v5906_v4  ;;  %5022 = vmatpush3.msra.mxu0 %v4295_v16 }
0x14ca   : > { %5023 = vmatprep.subr.mxu0 %v4294_v19 }
0x14cb   : > { %4997 = vmatprep.mubr.msk.f32.mxu0 %vm544_vm1, %v2986_v41  ;;  %5024 = vmatpush3.msra.mxu0 %v4294_v19 }
0x14cc   : > { %4998 = vmatmul.mubr.msk.f32.gmra.mxu0 %vm544_vm1, %v2987_v44  ;;  %5059 = vmatprep.subr.mxu0 %v5767_v23 }
0x1584   : > { %v4993_v61 = vpop.f32.mrf.mxu0 }
0x1585   : > { %v6088_v46 = vsub.f32 %v2983_v62, %v4993_v61 }
0x1586   : > { %v3072_v13 = vpop.f32.mrf.mxu0 }
0x1587   : > { %v6090_v1 = vsub.f32 %v2982_v11, %v3072_v13  ;;  %v3108_v58 = vmul.f32 %v6088_v46, %v6088_v46 }
0x1588   : > { %v4996_v47 = vpop.f32.mrf.mxu0 }
0x1589   : > { %v3107_v48 = vmul.f32 %v6090_v1, %v6090_v1  ;;  %v6096_v4 = vsub.f32 %v2985_v35, %v4996_v47 }
0x158a   : > { %v3082_v51 = vpop.f32.mrf.mxu0 }
0x158b   : > { %v6098_v8 = vsub.f32 %v2984_v2, %v3082_v51  ;;  %5008 = vmatprep.mubr.msk.f32.mxu1 %vm544_vm1, %v3107_v48  ;;  %v3110_v49 = vmul.f32 %v6096_v4, %v6096_v4  ;;  %v4299_v51 = vld [vmem:[%s6335_s2 + $0x408] sm:$0xff] }
0x158c   : > { %v4999_v32 = vpop.f32.mrf.mxu0  ;;  %5009 = vmatmul.mubr.msk.f32.vlgmr.msra.gmra.mxu1 %vm544_vm1, %v3108_v58 }
0x158d   : > { %v3109_v31 = vmul.f32 %v6098_v8, %v6098_v8  ;;  %v6106_v26 = vsub.f32 %v2987_v44, %v4999_v32  ;;  %5035 = vmatpush3.msra.mxu1 %v4305_v21  ;;  %v3261_v32 = vrot.slane %v5921_v57, %v5406_v27 }
0x158e   : > { %v3092_v50 = vpop.f32.mrf.mxu0  ;;  %5036 = vmatprep.subr.mxu1 %v4304_v36 }
0x158f   : > { %v6108_v20 = vsub.f32 %v2986_v41, %v3092_v50  ;;  %5011 = vmatprep.mubr.msk.f32.mxu1 %vm544_vm1, %v3109_v31  ;;  %v3112_v10 = vmul.f32 %v6106_v26, %v6106_v26  ;;  %5037 = vmatpush3.msra.mxu1 %v4304_v36 }
0x1590   : > { %5012 = vmatmul.mubr.msk.f32.gmra.mxu1 %vm544_vm1, %v3110_v49  ;;  %5038 = vmatprep.subr.mxu1 %v4303_v28 }
0x1591   : > { %v3111_v9 = vmul.f32 %v6108_v20, %v6108_v20  ;;  %5039 = vmatpush3.msra.mxu1 %v4303_v28 }
0x1592   : > { %5040 = vmatprep.subr.mxu1 %v4302_v33 }
0x1593   : > { %5014 = vmatprep.mubr.msk.f32.mxu1 %vm544_vm1, %v3111_v9  ;;  %5041 = vmatpush3.msra.mxu1 %v4302_v33 }
0x1594   : > { %5015 = vmatmul.mubr.msk.f32.gmra.mxu1 %vm544_vm1, %v3112_v10 }
0x164c   : > { %v5010_v22 = vpop.f32.mrf.mxu1 }
0x164d   : > { %v3203_v18 = vadd.f32 1e-05, %v5010_v22 }
0x164e   : > { %v3197_v38 = vpop.f32.mrf.mxu1 }
0x164f   : > { %5218 = vrsqrt.f32 %v3203_v18  ;;  %v3198_v40 = vadd.f32 1e-05, %v3197_v38  ;;  %v3384_v38 = vrot.slane %v5921_v57, %v5834_v34 }
0x1650   : > { %v5013_v63 = vpop.f32.mrf.mxu1 }
0x1651   : > { %5220 = vrsqrt.f32 %v3198_v40  ;;  %v3213_v6 = vadd.f32 1e-05, %v5013_v63 }
0x1652   : > { %v3207_v5 = vpop.f32.mrf.mxu1 }
0x1653   : > { %5222 = vrsqrt.f32 %v3213_v6  ;;  %v3208_v29 = vadd.f32 1e-05, %v3207_v5 }
0x1654   : > { %v5016_v42 = vpop.f32.mrf.mxu1 }
0x1655   : > { %5224 = vrsqrt.f32 %v3208_v29  ;;  %v3223_v12 = vadd.f32 1e-05, %v5016_v42 }
0x1656   : > { %v3217_v43 = vpop.f32.mrf.mxu1 }
0x1657   : > { %5226 = vrsqrt.f32 %v3223_v12  ;;  %v3218_v45 = vadd.f32 1e-05, %v3217_v43 }
0x1659   : > { %5228 = vrsqrt.f32 %v3218_v45 }
0x165c   : > { %v5219_v39 = vpop.eup %5218 }
0x165d   : > { %v3233_v11 = vmul.f32 %v5219_v39, %v6088_v46 }
0x165e   : > { %v5221_v62 = vpop.eup %5220 }
0x165f   : > { %v3232_v30 = vmul.f32 %v5221_v62, %v6090_v1  ;;  %v3243_v54 = vmul.f32 %v3241_v59, %v3233_v11 }
0x1660   : > { %v5223_v52 = vpop.eup %5222 }
0x1661   : > { %v3242_v2 = vmul.f32 %v3241_v59, %v3232_v30  ;;  %v3235_v35 = vmul.f32 %v5223_v52, %v6096_v4  ;;  %v6153_v55 = vadd.f32 %v3251_v53, %v3243_v54 }
0x1662   : > { %v5225_v3 = vpop.eup %5224 }
0x1663   : > { %v6150_v56 = vadd.f32 %v3251_v53, %v3242_v2  ;;  %v3234_v60 = vmul.f32 %v5225_v3, %v6098_v8  ;;  %v3245_v44 = vmul.f32 %v3241_v59, %v3235_v35  ;;  %v4298_v8 = vld [vmem:[%s6335_s2 + $0x400] sm:$0xff]  ;;  %v6231_v2 = vld [vmem:[%s6335_s2 + $0x188] sm:$0xff] }
0x1664   : > { %v5227_v41 = vpop.eup %5226 }
0x1665   : > { %5025 = vmatprep.mubr.msk.f32.mxu0 %vm544_vm1, %v6150_v56  ;;  %v3244_v61 = vmul.f32 %v3241_v59, %v3234_v60  ;;  %v3237_v46 = vmul.f32 %v5227_v41, %v6106_v26  ;;  %v6164_v47 = vadd.f32 %v3251_v53, %v3245_v44 }
0x1666   : > { %v5229_v24 = vpop.eup %5228  ;;  %5026 = vmatmul.mubr.msk.f32.vlgmr.msra.gmra.mxu0 %vm544_vm1, %v6153_v55 }
0x1667   : > { %v6160_v13 = vadd.f32 %v3251_v53, %v3244_v61  ;;  %v3236_v1 = vmul.f32 %v5229_v24, %v6108_v20  ;;  %5060 = vmatpush3.msra.mxu0 %v5767_v23  ;;  %v3247_v48 = vmul.f32 %v3241_v59, %v3237_v46 }
0x1668   : > { %5061 = vmatprep.subr.mxu0 %v5811_v15 }
0x1669   : > { %5028 = vmatprep.mubr.msk.f32.mxu0 %vm544_vm1, %v6160_v13  ;;  %v3246_v58 = vmul.f32 %v3241_v59, %v3236_v1  ;;  %5062 = vmatpush3.msra.mxu0 %v5811_v15  ;;  %v6176_v23 = vadd.f32 %v3251_v53, %v3247_v48  ;;  %v6187_v15 = vld [vmem:[%s6335_s2 + $0x198] sm:$0xff] }
0x166a   : > { %5029 = vmatmul.mubr.msk.f32.gmra.mxu0 %vm544_vm1, %v6164_v47  ;;  %5063 = vmatprep.subr.mxu0 %v5820_v17 }
0x166b   : > { %v6173_v4 = vadd.f32 %v3251_v53, %v3246_v58  ;;  %5064 = vmatpush3.msra.mxu0 %v5820_v17  ;;  %v4301_v17 = vld [vmem:[%s6335_s2 + $0x418] sm:$0xff]  ;;  %v6222_v53 = vld [vmem:[%s6335_s2 + $0x190] sm:$0xff] }
0x166c   : > { %5065 = vmatprep.subr.mxu0 %v5827_v25  ;;  %5042 = vmatprep.subr.mxu1 %v4301_v17 }
0x166d   : > { %5031 = vmatprep.mubr.msk.f32.mxu0 %vm544_vm1, %v6173_v4  ;;  %5066 = vmatpush3.msra.mxu0 %v5827_v25  ;;  %v4300_v25 = vld [vmem:[%s6335_s2 + $0x410] sm:$0xff] }
0x166e   : > { %5032 = vmatmul.mubr.msk.f32.gmra.mxu0 %vm544_vm1, %v6176_v23  ;;  %5076 = vmatprep.subr.mxu0 %v6187_v15 }
0x166f   : > { %5043 = vmatpush3.msra.mxu1 %v4301_v17 }
0x1670   : > { %5044 = vmatprep.subr.mxu1 %v4300_v25 }
0x1671   : > { %5045 = vmatpush3.msra.mxu1 %v4300_v25 }
0x1672   : > { %5046 = vmatprep.subr.mxu1 %v4299_v51 }
0x1673   : > { %5047 = vmatpush3.msra.mxu1 %v4299_v51 }
0x1674   : > { %5048 = vmatprep.subr.mxu1 %v4298_v8 }
0x1675   : > { %5049 = vmatpush3.msra.mxu1 %v4298_v8 }
0x1726   : > { %v5027_v31 = vpop.f32.mrf.mxu0 }
0x1727   : > { %v3352_v49 = vadd.f32 %v5027_v31, %v3261_v32 }
0x1728   : > { %v3346_v26 = vpop.f32.mrf.mxu0 }
0x1729   : > { %v3347_v50 = vadd.f32 %v3346_v26, %v3261_v32  ;;  %v3376_v10 = vmax.f32 %v3352_v49, 0.0 }
0x172a   : > { %v5030_v20 = vpop.f32.mrf.mxu0 }
0x172b   : > { %v3375_v9 = vmax.f32 %v3347_v50, 0.0  ;;  %v3362_v7 = vadd.f32 %v5030_v20, %v3261_v32 }
0x172c   : > { %v3356_v14 = vpop.f32.mrf.mxu0 }
0x172d   : > { %v3357_v16 = vadd.f32 %v3356_v14, %v3261_v32  ;;  %5050 = vmatprep.mubr.msk.f32.mxu1 %vm1952_vm3, %v3375_v9  ;;  %v3378_v36 = vmax.f32 %v3362_v7, 0.0 }
0x172e   : > { %v5033_v19 = vpop.f32.mrf.mxu0  ;;  %5051 = vmatmul.mubr.msk.f32.vlgmr.msra.gmra.mxu1 %vm1952_vm3, %v3376_v10 }
0x172f   : > { %v3377_v21 = vmax.f32 %v3357_v16, 0.0  ;;  %v3372_v28 = vadd.f32 %v5033_v19, %v3261_v32 }
0x1730   : > { %v3366_v33 = vpop.f32.mrf.mxu0 }
0x1731   : > { %v3367_v27 = vadd.f32 %v3366_v33, %v3261_v32  ;;  %5053 = vmatprep.mubr.msk.f32.mxu1 %vm1952_vm3, %v3377_v21  ;;  %v3380_v18 = vmax.f32 %v3372_v28, 0.0  ;;  %v5269_v32 = vmov 0.0  }
0x1732   : > { %5054 = vmatmul.mubr.msk.f32.gmra.mxu1 %vm1952_vm3, %v3378_v36  ;;  %5093 = vmatprep.subr.mxu1 %v5269_v32 }
0x1733   : > { %v3379_v22 = vmax.f32 %v3367_v27, 0.0 }
0x1735   : > { %5056 = vmatprep.mubr.msk.f32.mxu1 %vm1952_vm3, %v3379_v22 }
0x1736   : > { %5057 = vmatmul.mubr.msk.f32.gmra.mxu1 %vm1952_vm3, %v3380_v18  ;;  %v3757_v18 = vrot.slane %v5921_v57, %v5876_v37 }
0x1737   : > { %5105 = vmatprep.mubr.msk.f32.mxu1 %vm5270_vm4, %v5269_v32 }
0x17ee   : > { %v5052_v40 = vpop.f32.mrf.mxu1 }
0x17ef   : > { %v3475_v63 = vadd.f32 %v5052_v40, %v3384_v38 }
0x17f0   : > { %v3469_v6 = vpop.f32.mrf.mxu1 }
0x17f1   : > { %v3470_v5 = vadd.f32 %v3469_v6, %v3384_v38  ;;  %v3499_v12 = vadd.f32 %v3475_v63, %v6153_v55  ;;  %v3767_v6 = vrot.slane %v5921_v57, %v5881_v0 }
0x17f2   : > { %v5055_v29 = vpop.f32.mrf.mxu1 }
0x17f3   : > { %v3498_v42 = vadd.f32 %v3470_v5, %v6150_v56  ;;  %v3485_v43 = vadd.f32 %v5055_v29, %v3384_v38  ;;  %v6240_v56 = vld [vmem:[%s6335_s2 + $0x180] sm:$0xff] }
0x17f4   : > { %v3479_v45 = vpop.f32.mrf.mxu1 }
0x17f5   : > { %v3480_v39 = vadd.f32 %v3479_v45, %v3384_v38  ;;  %5067 = vmatprep.mubr.msk.f32.mxu0 %vm544_vm1, %v3498_v42  ;;  %v3501_v62 = vadd.f32 %v3485_v43, %v6164_v47 }
0x17f6   : > { %v5058_v59 = vpop.f32.mrf.mxu1  ;;  %5068 = vmatmul.mubr.msk.f32.vlgmr.msra.gmra.mxu0 %vm544_vm1, %v3499_v12 }
0x17f7   : > { %v3500_v11 = vadd.f32 %v3480_v39, %v6160_v13  ;;  %5077 = vmatpush3.msra.mxu0 %v6187_v15  ;;  %v3495_v30 = vadd.f32 %v5058_v59, %v3384_v38 }
0x17f8   : > { %v3489_v52 = vpop.f32.mrf.mxu1  ;;  %5078 = vmatprep.subr.mxu0 %v6222_v53 }
0x17f9   : > { %v3490_v54 = vadd.f32 %v3489_v52, %v3384_v38  ;;  %5070 = vmatprep.mubr.msk.f32.mxu0 %vm544_vm1, %v3500_v11  ;;  %5079 = vmatpush3.msra.mxu0 %v6222_v53  ;;  %v3503_v3 = vadd.f32 %v3495_v30, %v6176_v23 }
0x17fa   : > { %5071 = vmatmul.mubr.msk.f32.gmra.mxu0 %vm544_vm1, %v3501_v62  ;;  %5080 = vmatprep.subr.mxu0 %v6231_v2 }
0x17fb   : > { %v3502_v35 = vadd.f32 %v3490_v54, %v6173_v4  ;;  %5081 = vmatpush3.msra.mxu0 %v6231_v2 }
0x17fc   : > { %5082 = vmatprep.subr.mxu0 %v6240_v56 }
0x17fd   : > { %5073 = vmatprep.mubr.msk.f32.mxu0 %vm544_vm1, %v3502_v35  ;;  %5083 = vmatpush3.msra.mxu0 %v6240_v56 }
0x17fe   : > { %5074 = vmatmul.mubr.msk.f32.gmra.mxu0 %vm544_vm1, %v3503_v3  ;;  %5119 = vmatprep.subr.mxu0 %v5269_v32 }
0x18b6   : > { %v5069_v60 = vpop.f32.mrf.mxu0 }
0x18b7   : > { %v6246_v41 = vsub.f32 %v3499_v12, %v5069_v60  ;;  %v4179_v60 = vld [vmem:[%s6335_s2 + $0x200] sm:$0xff] }
0x18b8   : > { %v3588_v55 = vpop.f32.mrf.mxu0 }
0x18b9   : > { %v6248_v44 = vsub.f32 %v3498_v42, %v3588_v55  ;;  %v3624_v24 = vmul.f32 %v6246_v41, %v6246_v41 }
0x18ba   : > { %v5072_v61 = vpop.f32.mrf.mxu0 }
0x18bb   : > { %v3623_v46 = vmul.f32 %v6248_v44, %v6248_v44  ;;  %v3620_v13 = vsub.f32 %v3501_v62, %v5072_v61 }
0x18bc   : > { %v3598_v1 = vpop.f32.mrf.mxu0 }
0x18bd   : > { %v3619_v47 = vsub.f32 %v3500_v11, %v3598_v1  ;;  %5084 = vmatprep.mubr.msk.f32.mxu0 %vm544_vm1, %v3623_v46  ;;  %v3626_v4 = vmul.f32 %v3620_v13, %v3620_v13  ;;  %v4370_v46 = vld [vmem:[%s6335_s2 + $0x48] sm:$0xff] }
0x18be   : > { %v5075_v48 = vpop.f32.mrf.mxu0  ;;  %5085 = vmatmul.mubr.msk.f32.vlgmr.msra.gmra.mxu0 %vm544_vm1, %v3624_v24  ;;  %v4369_v24 = vld [vmem:[%s6335_s2 + $0x40] sm:$0xff] }
0x18bf   : > { %v3625_v58 = vmul.f32 %v3619_v47, %v3619_v47  ;;  %v3622_v23 = vsub.f32 %v3503_v3, %v5075_v48  ;;  %5120 = vmatpush3.msra.mxu0 %v6187_v15  ;;  %v5257_v48 = vld [vmem:[%s6334_s1] sm:$0xff] }
0x18c0   : > { %v3608_v17 = vpop.f32.mrf.mxu0  ;;  %5121 = vmatprep.subr.mxu0 %v5269_v32 }
0x18c1   : > { %v3621_v25 = vsub.f32 %v3502_v35, %v3608_v17  ;;  %5087 = vmatprep.mubr.msk.f32.mxu0 %vm544_vm1, %v3625_v58  ;;  %v3628_v8 = vmul.f32 %v3622_v23, %v3622_v23  ;;  %5122 = vmatpush3.msra.mxu0 %v6222_v53  ;;  %v4000_v58 = vrot.slane %v5257_v48, %v5834_v34 }
0x18c2   : > { %5088 = vmatmul.mubr.msk.f32.gmra.mxu0 %vm544_vm1, %v3626_v4  ;;  %5123 = vmatprep.subr.mxu0 %v5269_v32  ;;  %v4005_v17 = vrot.slane %v5257_v48, %v5876_v37 }
0x18c3   : > { %v3627_v51 = vmul.f32 %v3621_v25, %v3621_v25  ;;  %5124 = vmatpush3.msra.mxu0 %v6231_v2 }
0x18c4   : > { %5125 = vmatprep.subr.mxu0 %v5269_v32 }
0x18c5   : > { %5090 = vmatprep.mubr.msk.f32.mxu0 %vm544_vm1, %v3627_v51  ;;  %5126 = vmatpush3.msra.mxu0 %v6240_v56 }
0x18c6   : > { %5091 = vmatmul.mubr.msk.f32.gmra.mxu0 %vm544_vm1, %v3628_v8  ;;  %v4015_v8 = vrot.slane %v5257_v48, %v5881_v0 }
0x18c7   : > { %5127 = vmatprep.mubr.msk.f32.mxu0 %vm5270_vm4, %v5269_v32 }
0x197e   : > { %v5086_v31 = vpop.f32.mrf.mxu0 }
0x197f   : > { %v3719_v10 = vadd.f32 1e-05, %v5086_v31 }
0x1980   : > { %v3713_v49 = vpop.f32.mrf.mxu0 }
0x1981   : > { %v3714_v19 = vadd.f32 1e-05, %v3713_v49 }
0x1982   : > { %v5089_v26 = vpop.f32.mrf.mxu0 }
0x1983   : > { %v3729_v50 = vadd.f32 1e-05, %v5089_v26 }
0x1984   : > { %v3723_v20 = vpop.f32.mrf.mxu0 }
0x1985   : > { %v3724_v9 = vadd.f32 1e-05, %v3723_v20  ;;  %5230 = vrsqrt.f32 %v3729_v50 }
0x1986   : > { %v5092_v7 = vpop.f32.mrf.mxu0 }
0x1987   : > { %v3739_v14 = vadd.f32 1e-05, %v5092_v7  ;;  %5232 = vrsqrt.f32 %v3724_v9 }
0x1988   : > { %v3733_v16 = vpop.f32.mrf.mxu0 }
0x1989   : > { %5234 = vrsqrt.f32 %v3739_v14  ;;  %v3734_v21 = vadd.f32 1e-05, %v3733_v16 }
0x198a   : > { %5236 = vrsqrt.f32 %v3719_v10 }
0x198b   : > { %5238 = vrsqrt.f32 %v3734_v21 }
0x198c   : > { %5240 = vrsqrt.f32 %v3714_v19 }
0x1992   : > { %v5231_v36 = vpop.eup %5230 }
0x1993   : > { %v3751_v38 = vmul.f32 %v5231_v36, %v3620_v13 }
0x1994   : > { %v5233_v28 = vpop.eup %5232 }
0x1995   : > { %v3750_v29 = vmul.f32 %v5233_v28, %v3619_v47  ;;  %v3761_v45 = vmul.f32 %v3757_v18, %v3751_v38 }
0x1996   : > { %v5235_v33 = vpop.eup %5234 }
0x1997   : > { %v5237_v27 = vpop.eup %5236  ;;  %v3753_v22 = vmul.f32 %v5235_v33, %v3622_v23  ;;  %v3760_v11 = vmul.f32 %v3757_v18, %v3750_v29  ;;  %v3771_v30 = vadd.f32 %v3767_v6, %v3761_v45 }
0x1998   : > { %v5239_v40 = vpop.eup %5238  ;;  %v3749_v39 = vmul.f32 %v5237_v27, %v6246_v41 }
0x1999   : > { %v3763_v63 = vmul.f32 %v3757_v18, %v3753_v22  ;;  %v3752_v5 = vmul.f32 %v5239_v40, %v3621_v25  ;;  %v5241_v42 = vpop.eup %5240  ;;  %v3770_v57 = vadd.f32 %v3767_v6, %v3760_v11 }
0x199a   : > { %v3748_v62 = vmul.f32 %v5241_v42, %v6248_v44  ;;  %v3759_v52 = vmul.f32 %v3757_v18, %v3749_v39 }
0x199b   : > { %v3773_v12 = vadd.f32 %v3767_v6, %v3763_v63  ;;  %v3762_v43 = vmul.f32 %v3757_v18, %v3752_v5 }
0x199c   : > { %v3758_v54 = vmul.f32 %v3757_v18, %v3748_v62  ;;  %v3769_v35 = vadd.f32 %v3767_v6, %v3759_v52 }
0x199d   : > { %5094 = vmatpush3.msra.mxu1 %v3773_v12  ;;  %v3772_v59 = vadd.f32 %v3767_v6, %v3762_v43 }
0x199e   : > { %5095 = vmatprep.subr.mxu1 %v5269_v32  ;;  %v3768_v3 = vadd.f32 %v3767_v6, %v3758_v54 }
0x199f   : > { %5096 = vmatpush3.msra.mxu1 %v3772_v59 }
0x19a0   : > { %5097 = vmatprep.subr.mxu1 %v5269_v32 }
0x19a1   : > { %5098 = vmatpush3.msra.mxu1 %v3771_v30 }
0x19a2   : > { %5099 = vmatprep.subr.mxu1 %v5269_v32 }
0x19a3   : > { %5100 = vmatpush3.msra.mxu1 %v3770_v57 }
0x19a4   : > { %5101 = vmatprep.subr.mxu1 %v5269_v32 }
0x19a5   : > { %5102 = vmatpush3.msra.mxu1 %v3769_v35 }
0x19a6   : > { %5103 = vmatprep.subr.mxu1 %v5269_v32 }
0x19a7   : > { %5104 = vmatpush3.msra.mxu1 %v3768_v3 }
0x19a8   : > { %5106 = vmatmul.mubr.msk.f32.vlgmr.msra.gmra.mxu1 %vm1055_vm2, %v4179_v60  ;;  %5108 = vmatprep.subr.mxu1 %v5269_v32 }
0x19a9   : > { %5109 = vmatpush3.msra.mxu1 %v6187_v15  ;;  %5116 = vmatprep.mubr.msk.f32.mxu1 %vm5270_vm4, %v5269_v32 }
0x19aa   : > { %5110 = vmatprep.subr.mxu1 %v5269_v32 }
0x19ab   : > { %5111 = vmatpush3.msra.mxu1 %v6222_v53 }
0x19ac   : > { %5112 = vmatprep.subr.mxu1 %v5269_v32 }
0x19ad   : > { %5113 = vmatpush3.msra.mxu1 %v6231_v2  ;;  %v4372_v2 = vld [vmem:[%s6335_s2 + $0x58] sm:$0xff] }
0x19ae   : > { %5114 = vmatprep.subr.mxu1 %v5269_v32 }
0x19af   : > { %5115 = vmatpush3.msra.mxu1 %v6240_v56  ;;  %v4371_v56 = vld [vmem:[%s6335_s2 + $0x50] sm:$0xff] }
0x19b0   : > { %5130 = vmatprep.subr.mxu1 %v5269_v32 }
0x1a68   : > { %v3843_v41 = vpop.f32.mrf.mxu1 }
0x1a69   : > { %5117 = vmatmul.mubr.msk.f32.vlgmr.msra.gmra.mxu1 %vm544_vm1, %v3843_v41 }
0x1a6a   : > { %v5107_v15 = vpop.f32.mrf.mxu1  ;;  %5138 = vmatprep.mubr.msk.f32.mxu1 %vm5270_vm4, %v5269_v32  ;;  %5131 = vmatpush3.msra.mxu1 %v4372_v2 }
0x1a6b   : > { %5132 = vmatprep.subr.mxu1 %v5269_v32 }
0x1a6c   : > { %5133 = vmatpush3.msra.mxu1 %v4371_v56 }
0x1a6d   : > { %5134 = vmatprep.subr.mxu1 %v5269_v32 }
0x1a6e   : > { %5135 = vmatpush3.msra.mxu1 %v4370_v46 }
0x1a6f   : > { %5136 = vmatprep.subr.mxu1 %v5269_v32 }
0x1a70   : > { %5137 = vmatpush3.msra.mxu1 %v4369_v24 }
0x1b29   : > { %v3916_v55 = vpop.f32.mrf.mxu1 }
0x1b2a   : > { %v3920_v44 = vsub.f32 %v3843_v41, %v3916_v55 }
0x1b2b   : > { %v5118_v53 = vpop.f32.mrf.mxu1 }
0x1b2c   : > { %v3921_v61 = vmul.f32 %v3920_v44, %v3920_v44 }
0x1b2e   : > { %5128 = vmatmul.mubr.msk.f32.vlgmr.msra.gmra.mxu0 %vm544_vm1, %v3921_v61 }
0x1bee   : > { %v3991_v13 = vpop.f32.mrf.mxu0 }
0x1bef   : > { %v3992_v1 = vadd.f32 1e-05, %v3991_v13 }
0x1bf0   : > { %v5129_v47 = vpop.f32.mrf.mxu0 }
0x1bf1   : > { %5242 = vrsqrt.f32 %v3992_v1 }
0x1bfe   : > { %v5243_v4 = vpop.eup %5242 }
0x1bff   : > { %v3996_v23 = vmul.f32 %v5243_v4, %v3920_v44 }
0x1c01   : > { %v4001_v25 = vmul.f32 %v4000_v58, %v3996_v23 }
0x1c03   : > { %v4006_v51 = vadd.f32 %v4005_v17, %v4001_v25 }
0x1c05   : > { %5139 = vmatmul.mubr.msk.f32.vlgmr.msra.gmra.mxu1 %vm544_vm1, %v4006_v51 }
0x1cc5   : > { %v4085_v32 = vpop.f32.mrf.mxu1 }
0x1cc6   : > { %v4086_v31 = vadd.f32 %v4085_v32, %v4015_v8 }
0x1cc7   : > { %v5140_v34 = vpop.f32.mrf.mxu1 }
0x1cc8   : > { %4089 = vst [vmem:[%s170_s16] sm:$0xff] %v4086_v31 }
0x1cc9 PF: > { %s13_s12 = sadd.s32 1, %s5264_s12  }
0x1cca   : > { %p10_p5 = scmp.ge.s32.totalorder %s13_s12, 6  }
0x1ccc   :  { %12 = sbr.rel (!%p10_p5) target bundleno = 1 (0x1), region = 78 }

</bundles_post_ra>
